<compile_context>
chip_gen: v6e
topology: v6e:2x2x1
jax: 0.10.0
libtpu: 0.0.40
codegen_flags: <defaults>
</compile_context>

<pallas_src>
import jax
import jax.numpy as jnp
from jax import lax
from jax.experimental import pallas as pl
from jax.experimental.pallas import tpu as pltpu

# ----------------------------- sizes -----------------------------------------
B = 2            # batch
S = 8            # sequence length
H = 32           # embed_size == hidden_size
NUM_HEADS = 4
DH = H // NUM_HEADS
FFN = 4 * H      # 128
VOCAB = 128
PROMPT_LEN = 8   # prompt_length


def _is_v7x():
    """Best-effort generation check: v7x has 2 TensorCores/chip."""
    try:
        kind = jax.devices()[0].device_kind.lower()
    except Exception:
        return False
    return ("v7" in kind) or ("7x" in kind)


# ============================================================================
# Kernel 1: synthetic MLM backbone (forward() path)
# ============================================================================
def mlm_kernel(x_ref, mask_ref, wqkv_ref, bqkv_ref, wo_ref, bo_ref,
               ln1_ref, w1_ref, b1_ref, w2_ref, b2_ref, ln2_ref,
               wdec_ref, bdec_ref, out_ref):
    bb = mask_ref.shape[0]            # batches in this grid step
    Sn = mask_ref.shape[2]
    Hn = x_ref.shape[1]
    bf16 = jnp.bfloat16
    f32 = jnp.float32

    x = x_ref[...]                    # [bb*S, H] f32

    def layer_norm(v, gamma, beta):
        mu = jnp.mean(v, axis=-1, keepdims=True)
        var = jnp.mean((v - mu) ** 2, axis=-1, keepdims=True)
        return (v - mu) * lax.rsqrt(var + 1e-5) * gamma + beta

    def softmax(s):                   # EUP reciprocal instead of VPU divide
        s = s - jnp.max(s, axis=-1, keepdims=True)
        e = jnp.exp(s)
        return e * pl.reciprocal(jnp.sum(e, axis=-1, keepdims=True), approx=True)

    # QKV projection over the whole fused block (M = bb*S sublanes).
    qkv = jnp.dot(x.astype(bf16), wqkv_ref[...],
                  preferred_element_type=f32) + bqkv_ref[0][None, :]

    wo = wo_ref[...]                  # bf16 [H, H], loaded once
    scale = 1.0 / (DH ** 0.5)
    dn = (((1,), (1,)), ((), ()))     # contract last dims of both: q @ k^T (no transpose op)

    attn_rows = []
    for b in range(bb):               # static, bb <= 2
        qkv_b = qkv[b * Sn:(b + 1) * Sn, :]          # [S, 3H]
        bias = (mask_ref[b] - 1.0) * 1e9             # [1, S] additive key mask
        acc = jnp.zeros((Sn, Hn), f32)
        for h in range(NUM_HEADS):    # static per-head loop; concat folded into wo
            qh = qkv_b[:, h * DH:(h + 1) * DH].astype(bf16)
            kh = qkv_b[:, Hn + h * DH: Hn + (h + 1) * DH].astype(bf16)
            vh = qkv_b[:, 2 * Hn + h * DH: 2 * Hn + (h + 1) * DH].astype(bf16)
            sc = lax.dot_general(qh, kh, dn, preferred_element_type=f32) * scale + bias
            ph = softmax(sc)
            ctx = jnp.dot(ph.astype(bf16), vh, preferred_element_type=f32)
            acc = acc + jnp.dot(ctx.astype(bf16), wo[h * DH:(h + 1) * DH, :],
                                preferred_element_type=f32)
        attn_rows.append(acc)
    attn_out = attn_rows[0] if bb == 1 else jnp.concatenate(attn_rows, axis=0)
    attn_out = attn_out + bo_ref[0][None, :]

    h1 = layer_norm(x + attn_out, ln1_ref[0], ln1_ref[1])
    ffn = jax.nn.gelu(
        jnp.dot(h1.astype(bf16), w1_ref[...], preferred_element_type=f32) + b1_ref[0][None, :],
        approximate=True)
    ffn = jnp.dot(ffn.astype(bf16), w2_ref[...], preferred_element_type=f32) + b2_ref[0][None, :]
    h2 = layer_norm(h1 + ffn, ln2_ref[0], ln2_ref[1])

    logits = (jnp.dot(h2.astype(bf16), wdec_ref[...], preferred_element_type=f32)
              + bdec_ref[0][None, :])
    out_ref[...] = logits.astype(out_ref.dtype)


def continuous_prompt_forward(inputs_embeds, attention_mask, p):
    """forward(inputs_embeds, attention_mask) -> MLM token logits [B, S, V]."""
    Bn, Sn, Hn = inputs_embeds.shape
    Vn = p["wdec"].shape[1]

    # v5e/v6e (single TC): fuse batch into one grid step (kills per-step overhead,
    # doubles matmul M). v7x (2 TCs): one batch per step, "parallel" axis -> 2 cores.
    bb = 1 if _is_v7x() else Bn
    grid = (Bn // bb,)

    bf16 = jnp.bfloat16
    x2 = inputs_embeds.reshape(Bn * Sn, Hn)     # layout glue in the wrapper (free)
    wqkv = p["wqkv"].astype(bf16)
    wo = p["wo"].astype(bf16)
    w1 = p["w1"].astype(bf16)
    w2 = p["w2"].astype(bf16)
    wdec = p["wdec"].astype(bf16)

    def full_spec(a):
        return pl.BlockSpec(a.shape, lambda i, _nd=a.ndim: (0,) * _nd)

    in_specs = [
        pl.BlockSpec((bb * Sn, Hn), lambda i: (i, 0)),
        pl.BlockSpec((bb, 1, Sn), lambda i: (i, 0, 0)),
        full_spec(wqkv), full_spec(p["bqkv"]), full_spec(wo), full_spec(p["bo"]),
        full_spec(p["ln1"]), full_spec(w1), full_spec(p["bb1"]),
        full_spec(w2), full_spec(p["bb2"]), full_spec(p["ln2"]),
        full_spec(wdec), full_spec(p["bdec"]),
    ]
    out_spec = pl.BlockSpec((bb * Sn, Vn), lambda i: (i, 0))

    flat = pl.pallas_call(
        mlm_kernel,
        out_shape=jax.ShapeDtypeStruct((Bn * Sn, Vn), jnp.float32),
        grid_spec=pltpu.PrefetchScalarGridSpec(
            num_scalar_prefetch=0, grid=grid,
            in_specs=in_specs, out_specs=out_spec),
        compiler_params=pltpu.CompilerParams(dimension_semantics=("parallel",)),
    )(x2, attention_mask, wqkv, p["bqkv"], wo, p["bo"], p["ln1"],
      w1, p["bb1"], w2, p["bb2"], p["ln2"], wdec, p["bdec"])
    return flat.reshape(Bn, Sn, Vn)


# ============================================================================
# Kernel 2: prompt encoder (Embedding -> 2-layer BiLSTM -> Linear/ReLU/Linear)
# ============================================================================
def prompt_kernel(x_ref, wih0_ref, whh0_ref, bias0_ref,
                  wih1_ref, whh1_ref, bias1_ref,
                  w1_ref, b1_ref, w2_ref, b2_ref,
                  out_ref,
                  gif_ref, gib_ref, hf0_ref, hb0_ref, hf1_ref, hb1_ref):
    Pn, Hn = x_ref.shape              # (PROMPT_LEN, H)
    bf16 = jnp.bfloat16
    f32 = jnp.float32

    def run_layer(x_val, wih_ref, whh_ref, bias_ref, hf_out, hb_out):
        """One BiLSTM layer with fwd+bwd directions fused into a single unrolled loop."""
        xb = x_val.astype(bf16)
        # Input projections for all timesteps / both directions up front: [P, 4H] each.
        gif_ref[...] = jnp.dot(xb, wih_ref[0], preferred_element_type=f32) + bias_ref[0][None, :]
        gib_ref[...] = jnp.dot(xb, wih_ref[1], preferred_element_type=f32) + bias_ref[1][None, :]
        whh_f = whh_ref[0]            # bf16 [H, 4H], hoisted out of the loop
        whh_b = whh_ref[1]

        def gates(pre, c):            # PyTorch LSTM gate order: i, f, g, o (f32 math)
            ig = jax.nn.sigmoid(pre[:, 0:Hn])
            fg = jax.nn.sigmoid(pre[:, Hn:2 * Hn])
            gg = jnp.tanh(pre[:, 2 * Hn:3 * Hn])
            og = jax.nn.sigmoid(pre[:, 3 * Hn:4 * Hn])
            c_new = fg * c + ig * gg
            return og * jnp.tanh(c_new), c_new

        def step(i, carry):
            hf, cf, hb, cb = carry    # f32 carries [1, H]
            tb = Pn - 1 - i
            pre_f = gif_ref[pl.ds(i, 1), :] + jnp.dot(
                hf.astype(bf16), whh_f, preferred_element_type=f32)
            pre_b = gib_ref[pl.ds(tb, 1), :] + jnp.dot(
                hb.astype(bf16), whh_b, preferred_element_type=f32)
            hf, cf = gates(pre_f, cf)
            hb, cb = gates(pre_b, cb)
            hf_out[pl.ds(i, 1), :] = hf
            hb_out[pl.ds(tb, 1), :] = hb
            return (hf, cf, hb, cb)

        zero = jnp.zeros((1, Hn), f32)
        lax.fori_loop(0, Pn, step, (zero, zero, zero, zero), unroll=True)

    x0 = x_ref[...]
    run_layer(x0, wih0_ref, whh0_ref, bias0_ref, hf0_ref, hb0_ref)
    # Keep layer-1 input as a value (no scratch round-trip).
    x1 = jnp.concatenate([hf0_ref[...], hb0_ref[...]], axis=-1)    # [P, 2H]
    run_layer(x1, wih1_ref, whh1_ref, bias1_ref, hf1_ref, hb1_ref)

    y = jnp.concatenate([hf1_ref[...], hb1_ref[...]], axis=-1)     # [P, 2H]
    # mlp_head: Linear(2H, H) -> ReLU -> Linear(H, H)
    hid = jnp.maximum(
        jnp.dot(y.astype(bf16), w1_ref[...], preferred_element_type=f32) + b1_ref[0][None, :],
        0.0)
    out_ref[...] = (jnp.dot(hid.astype(bf16), w2_ref[...], preferred_element_type=f32)
                    + b2_ref[0][None, :]).astype(out_ref.dtype)


def encode_prompt(prompt_ids, p):
    """prompt_embeddings(ids) -> BiLSTM(2 layers, bidirectional) -> MLP head. Returns [P, H]."""
    x = jnp.take(p["prompt_embeddings"], prompt_ids, axis=0)   # glue: embedding lookup
    Pn, Hn = x.shape

    bf16 = jnp.bfloat16
    wih0 = p["wih0_t"].astype(bf16)
    whh0 = p["whh0_t"].astype(bf16)
    wih1 = p["wih1_t"].astype(bf16)
    whh1 = p["whh1_t"].astype(bf16)
    w1 = p["w1_t"].astype(bf16)
    w2 = p["w2_t"].astype(bf16)

    def full_spec(a):
        return pl.BlockSpec(a.shape, lambda i, _nd=a.ndim: (0,) * _nd)

    in_specs = [full_spec(x),
                full_spec(wih0), full_spec(whh0), full_spec(p["bias0"]),
                full_spec(wih1), full_spec(whh1), full_spec(p["bias1"]),
                full_spec(w1), full_spec(p["b1"]), full_spec(w2), full_spec(p["b2"])]
    out_spec = pl.BlockSpec((Pn, Hn), lambda i: (0, 0))
    scratch = [pltpu.VMEM((Pn, 4 * Hn), jnp.float32),   # fwd gate input projections
               pltpu.VMEM((Pn, 4 * Hn), jnp.float32),   # bwd gate input projections
               pltpu.VMEM((Pn, Hn), jnp.float32),       # layer-0 fwd hiddens
               pltpu.VMEM((Pn, Hn), jnp.float32),       # layer-0 bwd hiddens
               pltpu.VMEM((Pn, Hn), jnp.float32),       # layer-1 fwd hiddens
               pltpu.VMEM((Pn, Hn), jnp.float32)]       # layer-1 bwd hiddens

    # TODO(synk): on v7x the two LSTM directions could be split across the 2 TensorCores
    # (parallel grid axis + cross-core handoff between layers); kept single-core for
    # simplicity/portability since the fused-direction loop already halves the chain.
    return pl.pallas_call(
        prompt_kernel,
        out_shape=jax.ShapeDtypeStruct((Pn, Hn), jnp.float32),
        grid_spec=pltpu.PrefetchScalarGridSpec(
            num_scalar_prefetch=0, grid=(1,),
            in_specs=in_specs, out_specs=out_spec, scratch_shapes=scratch),
        compiler_params=pltpu.CompilerParams(dimension_semantics=("arbitrary",)),
    )(x, wih0, whh0, p["bias0"], wih1, whh1, p["bias1"],
      w1, p["b1"], w2, p["b2"])


# ============================================================================
# Deterministic parameter init (synthetic weights; shapes from __init__)
# ============================================================================
def init_params(key):
    ks = jax.random.split(key, 23)
    s = 0.05

    def n(k, shape):
        return (s * jax.random.normal(k, shape)).astype(jnp.float32)

    ones_zeros = jnp.concatenate([jnp.ones((1, H)), jnp.zeros((1, H))], axis=0).astype(jnp.float32)
    return {
        # prompt encoder params (owned by ContinuousPrompt)
        "prompt_embeddings": n(ks[0], (PROMPT_LEN, H)),
        "wih0_t": n(ks[1], (2, H, 4 * H)),      # [dir, H, 4H]  (W_ih^T), gate order i,f,g,o
        "whh0_t": n(ks[2], (2, H, 4 * H)),
        "bias0":  n(ks[3], (2, 4 * H)),          # b_ih + b_hh folded together
        "wih1_t": n(ks[4], (2, 2 * H, 4 * H)),
        "whh1_t": n(ks[5], (2, H, 4 * H)),
        "bias1":  n(ks[6], (2, 4 * H)),
        "w1_t": n(ks[7], (2 * H, H)), "b1": n(ks[8], (1, H)),
        "w2_t": n(ks[9], (H, H)),     "b2": n(ks[10], (1, H)),
        # synthetic MLM backbone params
        "wqkv": n(ks[11], (H, 3 * H)), "bqkv": n(ks[12], (1, 3 * H)),
        "wo": n(ks[13], (H, H)),       "bo": n(ks[14], (1, H)),
        "ln1": ones_zeros + n(ks[15], (2, H)),
        "w1": n(ks[16], (H, FFN)),     "bb1": n(ks[17], (1, FFN)),
        "w2": n(ks[18], (FFN, H)),     "bb2": n(ks[19], (1, H)),
        "ln2": ones_zeros + n(ks[20], (2, H)),
        "wdec": n(ks[21], (H, VOCAB)), "bdec": n(ks[22], (1, VOCAB)),
    }


# ============================================================================
# Pure-JAX references (f32 correctness check)
# ============================================================================
def ref_mlm(x, mask, p):
    def ln(v, g, b):
        mu = jnp.mean(v, axis=-1, keepdims=True)
        var = jnp.mean((v - mu) ** 2, axis=-1, keepdims=True)
        return (v - mu) / jnp.sqrt(var + 1e-5) * g + b

    outs = []
    for bi in range(x.shape[0]):
        xb = x[bi]
        bias = (mask[bi] - 1.0) * 1e9
        qkv = xb @ p["wqkv"] + p["bqkv"][0]
        heads = []
        for h in range(NUM_HEADS):
            qh = qkv[:, h * DH:(h + 1) * DH]
            kh = qkv[:, H + h * DH: H + (h + 1) * DH]
            vh = qkv[:, 2 * H + h * DH: 2 * H + (h + 1) * DH]
            sc = qh @ kh.T / (DH ** 0.5) + bias
            heads.append(jax.nn.softmax(sc, axis=-1) @ vh)
        ctx = jnp.concatenate(heads, axis=-1)
        h1 = ln(xb + ctx @ p["wo"] + p["bo"][0], p["ln1"][0], p["ln1"][1])
        ffn = jax.nn.gelu(h1 @ p["w1"] + p["bb1"][0], approximate=True) @ p["w2"] + p["bb2"][0]
        h2 = ln(h1 + ffn, p["ln2"][0], p["ln2"][1])
        outs.append(h2 @ p["wdec"] + p["bdec"][0])
    return jnp.stack(outs)


def ref_prompt(prompt_ids, p):
    x = jnp.take(p["prompt_embeddings"], prompt_ids, axis=0)
    Pn = x.shape[0]

    def run(xin, wih_t, whh_t, bias, reverse):
        gi = xin @ wih_t + bias[None, :]
        h = jnp.zeros((1, H)); c = jnp.zeros((1, H))
        outs = [None] * Pn
        order = range(Pn - 1, -1, -1) if reverse else range(Pn)
        for t in order:
            pre = gi[t:t + 1] + h @ whh_t
            ig = jax.nn.sigmoid(pre[:, 0:H]); fg = jax.nn.sigmoid(pre[:, H:2 * H])
            gg = jnp.tanh(pre[:, 2 * H:3 * H]); og = jax.nn.sigmoid(pre[:, 3 * H:4 * H])
            c = fg * c + ig * gg
            h = og * jnp.tanh(c)
            outs[t] = h[0]
        return jnp.stack(outs)

    f0 = run(x, p["wih0_t"][0], p["whh0_t"][0], p["bias0"][0], False)
    b0 = run(x, p["wih0_t"][1], p["whh0_t"][1], p["bias0"][1], True)
    x1 = jnp.concatenate([f0, b0], axis=-1)
    f1 = run(x1, p["wih1_t"][0], p["whh1_t"][0], p["bias1"][0], False)
    b1 = run(x1, p["wih1_t"][1], p["whh1_t"][1], p["bias1"][1], True)
    y = jnp.concatenate([f1, b1], axis=-1)
    hid = jnp.maximum(y @ p["w1_t"] + p["b1"][0], 0.0)
    return hid @ p["w2_t"] + p["b2"][0]


# ============================================================================
if __name__ == "__main__":
    key = jax.random.PRNGKey(0)
    k_param, k_x = jax.random.split(key)
    params = init_params(k_param)

    inputs_embeds = jax.random.normal(k_x, (B, S, H), dtype=jnp.float32)
    attention_mask = jnp.array(
        [[1] * S, [1] * (S - 3) + [0] * 3], dtype=jnp.float32).reshape(B, 1, S)
    prompt_ids = jnp.arange(PROMPT_LEN, dtype=jnp.int32)

    logits = continuous_prompt_forward(inputs_embeds, attention_mask, params)
    prompt_out = encode_prompt(prompt_ids, params)
    jax.block_until_ready((logits, prompt_out))

    # correctness vs f32 pure-JAX references (kernels use bf16 MXU inputs, f32 accumulation)
    with jax.default_matmul_precision("float32"):
        ref_l = ref_mlm(inputs_embeds, attention_mask, params)
        ref_p = ref_prompt(prompt_ids, params)
    err_l = float(jnp.max(jnp.abs(logits - ref_l)))
    err_p = float(jnp.max(jnp.abs(prompt_out - ref_p)))
    assert logits.shape == (B, S, VOCAB), logits.shape
    assert prompt_out.shape == (PROMPT_LEN, H), prompt_out.shape
    assert err_l < 2e-2, f"mlm kernel mismatch: {err_l}"
    assert err_p < 2e-2, f"prompt kernel mismatch: {err_p}"

    print("KERNEL_OK")
</pallas_src>

<mosaic_0001>
module attributes {stable_mosaic.version = 11 : i64} {
  func.func @mlm_kernel(%arg0: i32, %arg1: memref<16x32xf32, #tpu.memory_space<vmem>>, %arg2: memref<2x1x8xf32, #tpu.memory_space<vmem>>, %arg3: memref<32x96xbf16, #tpu.memory_space<vmem>>, %arg4: memref<1x96xf32, #tpu.memory_space<vmem>>, %arg5: memref<32x32xbf16, #tpu.memory_space<vmem>>, %arg6: memref<1x32xf32, #tpu.memory_space<vmem>>, %arg7: memref<2x32xf32, #tpu.memory_space<vmem>>, %arg8: memref<32x128xbf16, #tpu.memory_space<vmem>>, %arg9: memref<1x128xf32, #tpu.memory_space<vmem>>, %arg10: memref<128x32xbf16, #tpu.memory_space<vmem>>, %arg11: memref<1x32xf32, #tpu.memory_space<vmem>>, %arg12: memref<2x32xf32, #tpu.memory_space<vmem>>, %arg13: memref<32x128xbf16, #tpu.memory_space<vmem>>, %arg14: memref<1x128xf32, #tpu.memory_space<vmem>>, %arg15: memref<16x128xf32, #tpu.memory_space<vmem>>) attributes {dimension_semantics = [#tpu.dimension_semantics<parallel>], iteration_bounds = array<i64: 1>, scalar_prefetch = 0 : i64, scratch_operands = 0 : i64, tpu.core_type = #tpu.core_type<tc>, window_params = [{transform_indices = @transform_0, window_bounds = array<i64: 16, 32>}, {transform_indices = @transform_1, window_bounds = array<i64: 2, 1, 8>}, {pipeline_mode = #tpu.pipeline_mode<synchronous>, transform_indices = @transform_2, window_bounds = array<i64: 32, 96>}, {pipeline_mode = #tpu.pipeline_mode<synchronous>, transform_indices = @transform_3, window_bounds = array<i64: 1, 96>}, {pipeline_mode = #tpu.pipeline_mode<synchronous>, transform_indices = @transform_4, window_bounds = array<i64: 32, 32>}, {pipeline_mode = #tpu.pipeline_mode<synchronous>, transform_indices = @transform_5, window_bounds = array<i64: 1, 32>}, {pipeline_mode = #tpu.pipeline_mode<synchronous>, transform_indices = @transform_6, window_bounds = array<i64: 2, 32>}, {pipeline_mode = #tpu.pipeline_mode<synchronous>, transform_indices = @transform_7, window_bounds = array<i64: 32, 128>}, {pipeline_mode = #tpu.pipeline_mode<synchronous>, transform_indices = @transform_8, window_bounds = array<i64: 1, 128>}, {pipeline_mode = #tpu.pipeline_mode<synchronous>, transform_indices = @transform_9, window_bounds = array<i64: 128, 32>}, {pipeline_mode = #tpu.pipeline_mode<synchronous>, transform_indices = @transform_10, window_bounds = array<i64: 1, 32>}, {pipeline_mode = #tpu.pipeline_mode<synchronous>, transform_indices = @transform_11, window_bounds = array<i64: 2, 32>}, {pipeline_mode = #tpu.pipeline_mode<synchronous>, transform_indices = @transform_12, window_bounds = array<i64: 32, 128>}, {pipeline_mode = #tpu.pipeline_mode<synchronous>, transform_indices = @transform_13, window_bounds = array<i64: 1, 128>}, {transform_indices = @transform_14, window_bounds = array<i64: 16, 128>}]} {
    %c0 = arith.constant 0 : index
    %c0_0 = arith.constant 0 : index
    %0 = vector.load %arg1[%c0, %c0_0] : memref<16x32xf32, #tpu.memory_space<vmem>>, vector<16x32xf32>
    %1 = arith.truncf %0 : vector<16x32xf32> to vector<16x32xbf16>
    %c0_1 = arith.constant 0 : index
    %c0_2 = arith.constant 0 : index
    %2 = vector.load %arg3[%c0_1, %c0_2] : memref<32x96xbf16, #tpu.memory_space<vmem>>, vector<32x96xbf16>
    %cst = arith.constant dense<0.000000e+00> : vector<16x96xf32>
    %3 = tpu.matmul %1, %2, %cst {dimension_numbers = #tpu.dot_dimension_numbers<[1], [0], [0], [1], [0, 0, 1, 1], [], []>} : vector<16x32xbf16>, vector<32x96xbf16>, vector<16x96xf32> -> vector<16x96xf32>
    %c0_3 = arith.constant 0 : index
    %c0_4 = arith.constant 0 : index
    %4 = vector.load %arg4[%c0_3, %c0_4] : memref<1x96xf32, #tpu.memory_space<vmem>>, vector<1x96xf32>
    %5 = vector.shape_cast %4 : vector<1x96xf32> to vector<96xf32>
    %6 = vector.shape_cast %5 : vector<96xf32> to vector<1x96xf32>
    %7 = vector.broadcast %6 : vector<1x96xf32> to vector<16x96xf32>
    %8 = arith.addf %3, %7 : vector<16x96xf32>
    %c0_5 = arith.constant 0 : index
    %c0_6 = arith.constant 0 : index
    %9 = vector.load %arg5[%c0_5, %c0_6] : memref<32x32xbf16, #tpu.memory_space<vmem>>, vector<32x32xbf16>
    %10 = vector.extract_strided_slice %8 {offsets = [0, 0], sizes = [8, 96], strides = [1, 1]} : vector<16x96xf32> to vector<8x96xf32>
    %c0_7 = arith.constant 0 : index
    %c0_8 = arith.constant 0 : index
    %c0_9 = arith.constant 0 : index
    %11 = vector.load %arg2[%c0_7, %c0_8, %c0_9] : memref<2x1x8xf32, #tpu.memory_space<vmem>>, vector<1x1x8xf32>
    %12 = vector.shape_cast %11 : vector<1x1x8xf32> to vector<1x8xf32>
    %cst_10 = arith.constant 1.000000e+00 : f32
    %13 = vector.broadcast %cst_10 : f32 to vector<1x8xf32>
    %14 = arith.subf %12, %13 : vector<1x8xf32>
    %cst_11 = arith.constant 1.000000e+09 : f32
    %15 = vector.broadcast %cst_11 : f32 to vector<1x8xf32>
    %16 = arith.mulf %14, %15 : vector<1x8xf32>
    %cst_12 = arith.constant 0.000000e+00 : f32
    %17 = vector.broadcast %cst_12 : f32 to vector<8x32xf32>
    %18 = vector.extract_strided_slice %10 {offsets = [0, 0], sizes = [8, 8], strides = [1, 1]} : vector<8x96xf32> to vector<8x8xf32>
    %19 = arith.truncf %18 : vector<8x8xf32> to vector<8x8xbf16>
    %20 = vector.extract_strided_slice %10 {offsets = [0, 32], sizes = [8, 8], strides = [1, 1]} : vector<8x96xf32> to vector<8x8xf32>
    %21 = arith.truncf %20 : vector<8x8xf32> to vector<8x8xbf16>
    %22 = vector.extract_strided_slice %10 {offsets = [0, 64], sizes = [8, 8], strides = [1, 1]} : vector<8x96xf32> to vector<8x8xf32>
    %23 = arith.truncf %22 : vector<8x8xf32> to vector<8x8xbf16>
    %cst_13 = arith.constant dense<0.000000e+00> : vector<8x8xf32>
    %24 = tpu.matmul %19, %21, %cst_13 {dimension_numbers = #tpu.dot_dimension_numbers<[1], [1], [0], [0], [0, 0, 1, 0], [], []>} : vector<8x8xbf16>, vector<8x8xbf16>, vector<8x8xf32> -> vector<8x8xf32>
    %cst_14 = arith.constant 0.353553385 : f32
    %25 = vector.broadcast %cst_14 : f32 to vector<8x8xf32>
    %26 = arith.mulf %24, %25 : vector<8x8xf32>
    %27 = vector.broadcast %16 : vector<1x8xf32> to vector<8x8xf32>
    %28 = arith.addf %26, %27 : vector<8x8xf32>
    %cst_15 = arith.constant dense<0xFF800000> : vector<8xf32>
    %29 = vector.multi_reduction <maximumf>, %28, %cst_15 [1] : vector<8x8xf32> to vector<8xf32>
    %30 = vector.shape_cast %29 : vector<8xf32> to vector<8x1xf32>
    %31 = vector.broadcast %30 : vector<8x1xf32> to vector<8x8xf32>
    %32 = arith.subf %28, %31 : vector<8x8xf32>
    %33 = math.exp %32 : vector<8x8xf32>
    %cst_16 = arith.constant dense<0.000000e+00> : vector<8xf32>
    %34 = vector.multi_reduction <add>, %33, %cst_16 [1] : vector<8x8xf32> to vector<8xf32>
    %35 = vector.shape_cast %34 : vector<8xf32> to vector<8x1xf32>
    %36 = tpu.reciprocal %35 {approx = true} : vector<8x1xf32> -> vector<8x1xf32>
    %37 = vector.broadcast %36 : vector<8x1xf32> to vector<8x8xf32>
    %38 = arith.mulf %33, %37 : vector<8x8xf32>
    %39 = arith.truncf %38 : vector<8x8xf32> to vector<8x8xbf16>
    %cst_17 = arith.constant dense<0.000000e+00> : vector<8x8xf32>
    %40 = tpu.matmul %39, %23, %cst_17 {dimension_numbers = #tpu.dot_dimension_numbers<[1], [0], [0], [1], [0, 0, 1, 1], [], []>} : vector<8x8xbf16>, vector<8x8xbf16>, vector<8x8xf32> -> vector<8x8xf32>
    %41 = arith.truncf %40 : vector<8x8xf32> to vector<8x8xbf16>
    %42 = vector.extract_strided_slice %9 {offsets = [0, 0], sizes = [8, 32], strides = [1, 1]} : vector<32x32xbf16> to vector<8x32xbf16>
    %cst_18 = arith.constant dense<0.000000e+00> : vector<8x32xf32>
    %43 = tpu.matmul %41, %42, %cst_18 {dimension_numbers = #tpu.dot_dimension_numbers<[1], [0], [0], [1], [0, 0, 1, 1], [], []>} : vector<8x8xbf16>, vector<8x32xbf16>, vector<8x32xf32> -> vector<8x32xf32>
    %44 = arith.addf %17, %43 : vector<8x32xf32>
    %45 = vector.extract_strided_slice %10 {offsets = [0, 8], sizes = [8, 8], strides = [1, 1]} : vector<8x96xf32> to vector<8x8xf32>
    %46 = arith.truncf %45 : vector<8x8xf32> to vector<8x8xbf16>
    %47 = vector.extract_strided_slice %10 {offsets = [0, 40], sizes = [8, 8], strides = [1, 1]} : vector<8x96xf32> to vector<8x8xf32>
    %48 = arith.truncf %47 : vector<8x8xf32> to vector<8x8xbf16>
    %49 = vector.extract_strided_slice %10 {offsets = [0, 72], sizes = [8, 8], strides = [1, 1]} : vector<8x96xf32> to vector<8x8xf32>
    %50 = arith.truncf %49 : vector<8x8xf32> to vector<8x8xbf16>
    %cst_19 = arith.constant dense<0.000000e+00> : vector<8x8xf32>
    %51 = tpu.matmul %46, %48, %cst_19 {dimension_numbers = #tpu.dot_dimension_numbers<[1], [1], [0], [0], [0, 0, 1, 0], [], []>} : vector<8x8xbf16>, vector<8x8xbf16>, vector<8x8xf32> -> vector<8x8xf32>
    %cst_20 = arith.constant 0.353553385 : f32
    %52 = vector.broadcast %cst_20 : f32 to vector<8x8xf32>
    %53 = arith.mulf %51, %52 : vector<8x8xf32>
    %54 = vector.broadcast %16 : vector<1x8xf32> to vector<8x8xf32>
    %55 = arith.addf %53, %54 : vector<8x8xf32>
    %cst_21 = arith.constant dense<0xFF800000> : vector<8xf32>
    %56 = vector.multi_reduction <maximumf>, %55, %cst_21 [1] : vector<8x8xf32> to vector<8xf32>
    %57 = vector.shape_cast %56 : vector<8xf32> to vector<8x1xf32>
    %58 = vector.broadcast %57 : vector<8x1xf32> to vector<8x8xf32>
    %59 = arith.subf %55, %58 : vector<8x8xf32>
    %60 = math.exp %59 : vector<8x8xf32>
    %cst_22 = arith.constant dense<0.000000e+00> : vector<8xf32>
    %61 = vector.multi_reduction <add>, %60, %cst_22 [1] : vector<8x8xf32> to vector<8xf32>
    %62 = vector.shape_cast %61 : vector<8xf32> to vector<8x1xf32>
    %63 = tpu.reciprocal %62 {approx = true} : vector<8x1xf32> -> vector<8x1xf32>
    %64 = vector.broadcast %63 : vector<8x1xf32> to vector<8x8xf32>
    %65 = arith.mulf %60, %64 : vector<8x8xf32>
    %66 = arith.truncf %65 : vector<8x8xf32> to vector<8x8xbf16>
    %cst_23 = arith.constant dense<0.000000e+00> : vector<8x8xf32>
    %67 = tpu.matmul %66, %50, %cst_23 {dimension_numbers = #tpu.dot_dimension_numbers<[1], [0], [0], [1], [0, 0, 1, 1], [], []>} : vector<8x8xbf16>, vector<8x8xbf16>, vector<8x8xf32> -> vector<8x8xf32>
    %68 = arith.truncf %67 : vector<8x8xf32> to vector<8x8xbf16>
    %69 = vector.extract_strided_slice %9 {offsets = [8, 0], sizes = [8, 32], strides = [1, 1]} : vector<32x32xbf16> to vector<8x32xbf16>
    %cst_24 = arith.constant dense<0.000000e+00> : vector<8x32xf32>
    %70 = tpu.matmul %68, %69, %cst_24 {dimension_numbers = #tpu.dot_dimension_numbers<[1], [0], [0], [1], [0, 0, 1, 1], [], []>} : vector<8x8xbf16>, vector<8x32xbf16>, vector<8x32xf32> -> vector<8x32xf32>
    %71 = arith.addf %44, %70 : vector<8x32xf32>
    %72 = vector.extract_strided_slice %10 {offsets = [0, 16], sizes = [8, 8], strides = [1, 1]} : vector<8x96xf32> to vector<8x8xf32>
    %73 = arith.truncf %72 : vector<8x8xf32> to vector<8x8xbf16>
    %74 = vector.extract_strided_slice %10 {offsets = [0, 48], sizes = [8, 8], strides = [1, 1]} : vector<8x96xf32> to vector<8x8xf32>
    %75 = arith.truncf %74 : vector<8x8xf32> to vector<8x8xbf16>
    %76 = vector.extract_strided_slice %10 {offsets = [0, 80], sizes = [8, 8], strides = [1, 1]} : vector<8x96xf32> to vector<8x8xf32>
    %77 = arith.truncf %76 : vector<8x8xf32> to vector<8x8xbf16>
    %cst_25 = arith.constant dense<0.000000e+00> : vector<8x8xf32>
    %78 = tpu.matmul %73, %75, %cst_25 {dimension_numbers = #tpu.dot_dimension_numbers<[1], [1], [0], [0], [0, 0, 1, 0], [], []>} : vector<8x8xbf16>, vector<8x8xbf16>, vector<8x8xf32> -> vector<8x8xf32>
    %cst_26 = arith.constant 0.353553385 : f32
    %79 = vector.broadcast %cst_26 : f32 to vector<8x8xf32>
    %80 = arith.mulf %78, %79 : vector<8x8xf32>
    %81 = vector.broadcast %16 : vector<1x8xf32> to vector<8x8xf32>
    %82 = arith.addf %80, %81 : vector<8x8xf32>
    %cst_27 = arith.constant dense<0xFF800000> : vector<8xf32>
    %83 = vector.multi_reduction <maximumf>, %82, %cst_27 [1] : vector<8x8xf32> to vector<8xf32>
    %84 = vector.shape_cast %83 : vector<8xf32> to vector<8x1xf32>
    %85 = vector.broadcast %84 : vector<8x1xf32> to vector<8x8xf32>
    %86 = arith.subf %82, %85 : vector<8x8xf32>
    %87 = math.exp %86 : vector<8x8xf32>
    %cst_28 = arith.constant dense<0.000000e+00> : vector<8xf32>
    %88 = vector.multi_reduction <add>, %87, %cst_28 [1] : vector<8x8xf32> to vector<8xf32>
    %89 = vector.shape_cast %88 : vector<8xf32> to vector<8x1xf32>
    %90 = tpu.reciprocal %89 {approx = true} : vector<8x1xf32> -> vector<8x1xf32>
    %91 = vector.broadcast %90 : vector<8x1xf32> to vector<8x8xf32>
    %92 = arith.mulf %87, %91 : vector<8x8xf32>
    %93 = arith.truncf %92 : vector<8x8xf32> to vector<8x8xbf16>
    %cst_29 = arith.constant dense<0.000000e+00> : vector<8x8xf32>
    %94 = tpu.matmul %93, %77, %cst_29 {dimension_numbers = #tpu.dot_dimension_numbers<[1], [0], [0], [1], [0, 0, 1, 1], [], []>} : vector<8x8xbf16>, vector<8x8xbf16>, vector<8x8xf32> -> vector<8x8xf32>
    %95 = arith.truncf %94 : vector<8x8xf32> to vector<8x8xbf16>
    %96 = vector.extract_strided_slice %9 {offsets = [16, 0], sizes = [8, 32], strides = [1, 1]} : vector<32x32xbf16> to vector<8x32xbf16>
    %cst_30 = arith.constant dense<0.000000e+00> : vector<8x32xf32>
    %97 = tpu.matmul %95, %96, %cst_30 {dimension_numbers = #tpu.dot_dimension_numbers<[1], [0], [0], [1], [0, 0, 1, 1], [], []>} : vector<8x8xbf16>, vector<8x32xbf16>, vector<8x32xf32> -> vector<8x32xf32>
    %98 = arith.addf %71, %97 : vector<8x32xf32>
    %99 = vector.extract_strided_slice %10 {offsets = [0, 24], sizes = [8, 8], strides = [1, 1]} : vector<8x96xf32> to vector<8x8xf32>
    %100 = arith.truncf %99 : vector<8x8xf32> to vector<8x8xbf16>
    %101 = vector.extract_strided_slice %10 {offsets = [0, 56], sizes = [8, 8], strides = [1, 1]} : vector<8x96xf32> to vector<8x8xf32>
    %102 = arith.truncf %101 : vector<8x8xf32> to vector<8x8xbf16>
    %103 = vector.extract_strided_slice %10 {offsets = [0, 88], sizes = [8, 8], strides = [1, 1]} : vector<8x96xf32> to vector<8x8xf32>
    %104 = arith.truncf %103 : vector<8x8xf32> to vector<8x8xbf16>
    %cst_31 = arith.constant dense<0.000000e+00> : vector<8x8xf32>
    %105 = tpu.matmul %100, %102, %cst_31 {dimension_numbers = #tpu.dot_dimension_numbers<[1], [1], [0], [0], [0, 0, 1, 0], [], []>} : vector<8x8xbf16>, vector<8x8xbf16>, vector<8x8xf32> -> vector<8x8xf32>
    %cst_32 = arith.constant 0.353553385 : f32
    %106 = vector.broadcast %cst_32 : f32 to vector<8x8xf32>
    %107 = arith.mulf %105, %106 : vector<8x8xf32>
    %108 = vector.broadcast %16 : vector<1x8xf32> to vector<8x8xf32>
    %109 = arith.addf %107, %108 : vector<8x8xf32>
    %cst_33 = arith.constant dense<0xFF800000> : vector<8xf32>
    %110 = vector.multi_reduction <maximumf>, %109, %cst_33 [1] : vector<8x8xf32> to vector<8xf32>
    %111 = vector.shape_cast %110 : vector<8xf32> to vector<8x1xf32>
    %112 = vector.broadcast %111 : vector<8x1xf32> to vector<8x8xf32>
    %113 = arith.subf %109, %112 : vector<8x8xf32>
    %114 = math.exp %113 : vector<8x8xf32>
    %cst_34 = arith.constant dense<0.000000e+00> : vector<8xf32>
    %115 = vector.multi_reduction <add>, %114, %cst_34 [1] : vector<8x8xf32> to vector<8xf32>
    %116 = vector.shape_cast %115 : vector<8xf32> to vector<8x1xf32>
    %117 = tpu.reciprocal %116 {approx = true} : vector<8x1xf32> -> vector<8x1xf32>
    %118 = vector.broadcast %117 : vector<8x1xf32> to vector<8x8xf32>
    %119 = arith.mulf %114, %118 : vector<8x8xf32>
    %120 = arith.truncf %119 : vector<8x8xf32> to vector<8x8xbf16>
    %cst_35 = arith.constant dense<0.000000e+00> : vector<8x8xf32>
    %121 = tpu.matmul %120, %104, %cst_35 {dimension_numbers = #tpu.dot_dimension_numbers<[1], [0], [0], [1], [0, 0, 1, 1], [], []>} : vector<8x8xbf16>, vector<8x8xbf16>, vector<8x8xf32> -> vector<8x8xf32>
    %122 = arith.truncf %121 : vector<8x8xf32> to vector<8x8xbf16>
    %123 = vector.extract_strided_slice %9 {offsets = [24, 0], sizes = [8, 32], strides = [1, 1]} : vector<32x32xbf16> to vector<8x32xbf16>
    %cst_36 = arith.constant dense<0.000000e+00> : vector<8x32xf32>
    %124 = tpu.matmul %122, %123, %cst_36 {dimension_numbers = #tpu.dot_dimension_numbers<[1], [0], [0], [1], [0, 0, 1, 1], [], []>} : vector<8x8xbf16>, vector<8x32xbf16>, vector<8x32xf32> -> vector<8x32xf32>
    %125 = arith.addf %98, %124 : vector<8x32xf32>
    %126 = vector.extract_strided_slice %8 {offsets = [8, 0], sizes = [8, 96], strides = [1, 1]} : vector<16x96xf32> to vector<8x96xf32>
    %c1 = arith.constant 1 : index
    %c0_37 = arith.constant 0 : index
    %c0_38 = arith.constant 0 : index
    %127 = vector.load %arg2[%c1, %c0_37, %c0_38] : memref<2x1x8xf32, #tpu.memory_space<vmem>>, vector<1x1x8xf32>
    %128 = vector.shape_cast %127 : vector<1x1x8xf32> to vector<1x8xf32>
    %cst_39 = arith.constant 1.000000e+00 : f32
    %129 = vector.broadcast %cst_39 : f32 to vector<1x8xf32>
    %130 = arith.subf %128, %129 : vector<1x8xf32>
    %cst_40 = arith.constant 1.000000e+09 : f32
    %131 = vector.broadcast %cst_40 : f32 to vector<1x8xf32>
    %132 = arith.mulf %130, %131 : vector<1x8xf32>
    %cst_41 = arith.constant 0.000000e+00 : f32
    %133 = vector.broadcast %cst_41 : f32 to vector<8x32xf32>
    %134 = vector.extract_strided_slice %126 {offsets = [0, 0], sizes = [8, 8], strides = [1, 1]} : vector<8x96xf32> to vector<8x8xf32>
    %135 = arith.truncf %134 : vector<8x8xf32> to vector<8x8xbf16>
    %136 = vector.extract_strided_slice %126 {offsets = [0, 32], sizes = [8, 8], strides = [1, 1]} : vector<8x96xf32> to vector<8x8xf32>
    %137 = arith.truncf %136 : vector<8x8xf32> to vector<8x8xbf16>
    %138 = vector.extract_strided_slice %126 {offsets = [0, 64], sizes = [8, 8], strides = [1, 1]} : vector<8x96xf32> to vector<8x8xf32>
    %139 = arith.truncf %138 : vector<8x8xf32> to vector<8x8xbf16>
    %cst_42 = arith.constant dense<0.000000e+00> : vector<8x8xf32>
    %140 = tpu.matmul %135, %137, %cst_42 {dimension_numbers = #tpu.dot_dimension_numbers<[1], [1], [0], [0], [0, 0, 1, 0], [], []>} : vector<8x8xbf16>, vector<8x8xbf16>, vector<8x8xf32> -> vector<8x8xf32>
    %cst_43 = arith.constant 0.353553385 : f32
    %141 = vector.broadcast %cst_43 : f32 to vector<8x8xf32>
    %142 = arith.mulf %140, %141 : vector<8x8xf32>
    %143 = vector.broadcast %132 : vector<1x8xf32> to vector<8x8xf32>
    %144 = arith.addf %142, %143 : vector<8x8xf32>
    %cst_44 = arith.constant dense<0xFF800000> : vector<8xf32>
    %145 = vector.multi_reduction <maximumf>, %144, %cst_44 [1] : vector<8x8xf32> to vector<8xf32>
    %146 = vector.shape_cast %145 : vector<8xf32> to vector<8x1xf32>
    %147 = vector.broadcast %146 : vector<8x1xf32> to vector<8x8xf32>
    %148 = arith.subf %144, %147 : vector<8x8xf32>
    %149 = math.exp %148 : vector<8x8xf32>
    %cst_45 = arith.constant dense<0.000000e+00> : vector<8xf32>
    %150 = vector.multi_reduction <add>, %149, %cst_45 [1] : vector<8x8xf32> to vector<8xf32>
    %151 = vector.shape_cast %150 : vector<8xf32> to vector<8x1xf32>
    %152 = tpu.reciprocal %151 {approx = true} : vector<8x1xf32> -> vector<8x1xf32>
    %153 = vector.broadcast %152 : vector<8x1xf32> to vector<8x8xf32>
    %154 = arith.mulf %149, %153 : vector<8x8xf32>
    %155 = arith.truncf %154 : vector<8x8xf32> to vector<8x8xbf16>
    %cst_46 = arith.constant dense<0.000000e+00> : vector<8x8xf32>
    %156 = tpu.matmul %155, %139, %cst_46 {dimension_numbers = #tpu.dot_dimension_numbers<[1], [0], [0], [1], [0, 0, 1, 1], [], []>} : vector<8x8xbf16>, vector<8x8xbf16>, vector<8x8xf32> -> vector<8x8xf32>
    %157 = arith.truncf %156 : vector<8x8xf32> to vector<8x8xbf16>
    %158 = vector.extract_strided_slice %9 {offsets = [0, 0], sizes = [8, 32], strides = [1, 1]} : vector<32x32xbf16> to vector<8x32xbf16>
    %cst_47 = arith.constant dense<0.000000e+00> : vector<8x32xf32>
    %159 = tpu.matmul %157, %158, %cst_47 {dimension_numbers = #tpu.dot_dimension_numbers<[1], [0], [0], [1], [0, 0, 1, 1], [], []>} : vector<8x8xbf16>, vector<8x32xbf16>, vector<8x32xf32> -> vector<8x32xf32>
    %160 = arith.addf %133, %159 : vector<8x32xf32>
    %161 = vector.extract_strided_slice %126 {offsets = [0, 8], sizes = [8, 8], strides = [1, 1]} : vector<8x96xf32> to vector<8x8xf32>
    %162 = arith.truncf %161 : vector<8x8xf32> to vector<8x8xbf16>
    %163 = vector.extract_strided_slice %126 {offsets = [0, 40], sizes = [8, 8], strides = [1, 1]} : vector<8x96xf32> to vector<8x8xf32>
    %164 = arith.truncf %163 : vector<8x8xf32> to vector<8x8xbf16>
    %165 = vector.extract_strided_slice %126 {offsets = [0, 72], sizes = [8, 8], strides = [1, 1]} : vector<8x96xf32> to vector<8x8xf32>
    %166 = arith.truncf %165 : vector<8x8xf32> to vector<8x8xbf16>
    %cst_48 = arith.constant dense<0.000000e+00> : vector<8x8xf32>
    %167 = tpu.matmul %162, %164, %cst_48 {dimension_numbers = #tpu.dot_dimension_numbers<[1], [1], [0], [0], [0, 0, 1, 0], [], []>} : vector<8x8xbf16>, vector<8x8xbf16>, vector<8x8xf32> -> vector<8x8xf32>
    %cst_49 = arith.constant 0.353553385 : f32
    %168 = vector.broadcast %cst_49 : f32 to vector<8x8xf32>
    %169 = arith.mulf %167, %168 : vector<8x8xf32>
    %170 = vector.broadcast %132 : vector<1x8xf32> to vector<8x8xf32>
    %171 = arith.addf %169, %170 : vector<8x8xf32>
    %cst_50 = arith.constant dense<0xFF800000> : vector<8xf32>
    %172 = vector.multi_reduction <maximumf>, %171, %cst_50 [1] : vector<8x8xf32> to vector<8xf32>
    %173 = vector.shape_cast %172 : vector<8xf32> to vector<8x1xf32>
    %174 = vector.broadcast %173 : vector<8x1xf32> to vector<8x8xf32>
    %175 = arith.subf %171, %174 : vector<8x8xf32>
    %176 = math.exp %175 : vector<8x8xf32>
    %cst_51 = arith.constant dense<0.000000e+00> : vector<8xf32>
    %177 = vector.multi_reduction <add>, %176, %cst_51 [1] : vector<8x8xf32> to vector<8xf32>
    %178 = vector.shape_cast %177 : vector<8xf32> to vector<8x1xf32>
    %179 = tpu.reciprocal %178 {approx = true} : vector<8x1xf32> -> vector<8x1xf32>
    %180 = vector.broadcast %179 : vector<8x1xf32> to vector<8x8xf32>
    %181 = arith.mulf %176, %180 : vector<8x8xf32>
    %182 = arith.truncf %181 : vector<8x8xf32> to vector<8x8xbf16>
    %cst_52 = arith.constant dense<0.000000e+00> : vector<8x8xf32>
    %183 = tpu.matmul %182, %166, %cst_52 {dimension_numbers = #tpu.dot_dimension_numbers<[1], [0], [0], [1], [0, 0, 1, 1], [], []>} : vector<8x8xbf16>, vector<8x8xbf16>, vector<8x8xf32> -> vector<8x8xf32>
    %184 = arith.truncf %183 : vector<8x8xf32> to vector<8x8xbf16>
    %185 = vector.extract_strided_slice %9 {offsets = [8, 0], sizes = [8, 32], strides = [1, 1]} : vector<32x32xbf16> to vector<8x32xbf16>
    %cst_53 = arith.constant dense<0.000000e+00> : vector<8x32xf32>
    %186 = tpu.matmul %184, %185, %cst_53 {dimension_numbers = #tpu.dot_dimension_numbers<[1], [0], [0], [1], [0, 0, 1, 1], [], []>} : vector<8x8xbf16>, vector<8x32xbf16>, vector<8x32xf32> -> vector<8x32xf32>
    %187 = arith.addf %160, %186 : vector<8x32xf32>
    %188 = vector.extract_strided_slice %126 {offsets = [0, 16], sizes = [8, 8], strides = [1, 1]} : vector<8x96xf32> to vector<8x8xf32>
    %189 = arith.truncf %188 : vector<8x8xf32> to vector<8x8xbf16>
    %190 = vector.extract_strided_slice %126 {offsets = [0, 48], sizes = [8, 8], strides = [1, 1]} : vector<8x96xf32> to vector<8x8xf32>
    %191 = arith.truncf %190 : vector<8x8xf32> to vector<8x8xbf16>
    %192 = vector.extract_strided_slice %126 {offsets = [0, 80], sizes = [8, 8], strides = [1, 1]} : vector<8x96xf32> to vector<8x8xf32>
    %193 = arith.truncf %192 : vector<8x8xf32> to vector<8x8xbf16>
    %cst_54 = arith.constant dense<0.000000e+00> : vector<8x8xf32>
    %194 = tpu.matmul %189, %191, %cst_54 {dimension_numbers = #tpu.dot_dimension_numbers<[1], [1], [0], [0], [0, 0, 1, 0], [], []>} : vector<8x8xbf16>, vector<8x8xbf16>, vector<8x8xf32> -> vector<8x8xf32>
    %cst_55 = arith.constant 0.353553385 : f32
    %195 = vector.broadcast %cst_55 : f32 to vector<8x8xf32>
    %196 = arith.mulf %194, %195 : vector<8x8xf32>
    %197 = vector.broadcast %132 : vector<1x8xf32> to vector<8x8xf32>
    %198 = arith.addf %196, %197 : vector<8x8xf32>
    %cst_56 = arith.constant dense<0xFF800000> : vector<8xf32>
    %199 = vector.multi_reduction <maximumf>, %198, %cst_56 [1] : vector<8x8xf32> to vector<8xf32>
    %200 = vector.shape_cast %199 : vector<8xf32> to vector<8x1xf32>
    %201 = vector.broadcast %200 : vector<8x1xf32> to vector<8x8xf32>
    %202 = arith.subf %198, %201 : vector<8x8xf32>
    %203 = math.exp %202 : vector<8x8xf32>
    %cst_57 = arith.constant dense<0.000000e+00> : vector<8xf32>
    %204 = vector.multi_reduction <add>, %203, %cst_57 [1] : vector<8x8xf32> to vector<8xf32>
    %205 = vector.shape_cast %204 : vector<8xf32> to vector<8x1xf32>
    %206 = tpu.reciprocal %205 {approx = true} : vector<8x1xf32> -> vector<8x1xf32>
    %207 = vector.broadcast %206 : vector<8x1xf32> to vector<8x8xf32>
    %208 = arith.mulf %203, %207 : vector<8x8xf32>
    %209 = arith.truncf %208 : vector<8x8xf32> to vector<8x8xbf16>
    %cst_58 = arith.constant dense<0.000000e+00> : vector<8x8xf32>
    %210 = tpu.matmul %209, %193, %cst_58 {dimension_numbers = #tpu.dot_dimension_numbers<[1], [0], [0], [1], [0, 0, 1, 1], [], []>} : vector<8x8xbf16>, vector<8x8xbf16>, vector<8x8xf32> -> vector<8x8xf32>
    %211 = arith.truncf %210 : vector<8x8xf32> to vector<8x8xbf16>
    %212 = vector.extract_strided_slice %9 {offsets = [16, 0], sizes = [8, 32], strides = [1, 1]} : vector<32x32xbf16> to vector<8x32xbf16>
    %cst_59 = arith.constant dense<0.000000e+00> : vector<8x32xf32>
    %213 = tpu.matmul %211, %212, %cst_59 {dimension_numbers = #tpu.dot_dimension_numbers<[1], [0], [0], [1], [0, 0, 1, 1], [], []>} : vector<8x8xbf16>, vector<8x32xbf16>, vector<8x32xf32> -> vector<8x32xf32>
    %214 = arith.addf %187, %213 : vector<8x32xf32>
    %215 = vector.extract_strided_slice %126 {offsets = [0, 24], sizes = [8, 8], strides = [1, 1]} : vector<8x96xf32> to vector<8x8xf32>
    %216 = arith.truncf %215 : vector<8x8xf32> to vector<8x8xbf16>
    %217 = vector.extract_strided_slice %126 {offsets = [0, 56], sizes = [8, 8], strides = [1, 1]} : vector<8x96xf32> to vector<8x8xf32>
    %218 = arith.truncf %217 : vector<8x8xf32> to vector<8x8xbf16>
    %219 = vector.extract_strided_slice %126 {offsets = [0, 88], sizes = [8, 8], strides = [1, 1]} : vector<8x96xf32> to vector<8x8xf32>
    %220 = arith.truncf %219 : vector<8x8xf32> to vector<8x8xbf16>
    %cst_60 = arith.constant dense<0.000000e+00> : vector<8x8xf32>
    %221 = tpu.matmul %216, %218, %cst_60 {dimension_numbers = #tpu.dot_dimension_numbers<[1], [1], [0], [0], [0, 0, 1, 0], [], []>} : vector<8x8xbf16>, vector<8x8xbf16>, vector<8x8xf32> -> vector<8x8xf32>
    %cst_61 = arith.constant 0.353553385 : f32
    %222 = vector.broadcast %cst_61 : f32 to vector<8x8xf32>
    %223 = arith.mulf %221, %222 : vector<8x8xf32>
    %224 = vector.broadcast %132 : vector<1x8xf32> to vector<8x8xf32>
    %225 = arith.addf %223, %224 : vector<8x8xf32>
    %cst_62 = arith.constant dense<0xFF800000> : vector<8xf32>
    %226 = vector.multi_reduction <maximumf>, %225, %cst_62 [1] : vector<8x8xf32> to vector<8xf32>
    %227 = vector.shape_cast %226 : vector<8xf32> to vector<8x1xf32>
    %228 = vector.broadcast %227 : vector<8x1xf32> to vector<8x8xf32>
    %229 = arith.subf %225, %228 : vector<8x8xf32>
    %230 = math.exp %229 : vector<8x8xf32>
    %cst_63 = arith.constant dense<0.000000e+00> : vector<8xf32>
    %231 = vector.multi_reduction <add>, %230, %cst_63 [1] : vector<8x8xf32> to vector<8xf32>
    %232 = vector.shape_cast %231 : vector<8xf32> to vector<8x1xf32>
    %233 = tpu.reciprocal %232 {approx = true} : vector<8x1xf32> -> vector<8x1xf32>
    %234 = vector.broadcast %233 : vector<8x1xf32> to vector<8x8xf32>
    %235 = arith.mulf %230, %234 : vector<8x8xf32>
    %236 = arith.truncf %235 : vector<8x8xf32> to vector<8x8xbf16>
    %cst_64 = arith.constant dense<0.000000e+00> : vector<8x8xf32>
    %237 = tpu.matmul %236, %220, %cst_64 {dimension_numbers = #tpu.dot_dimension_numbers<[1], [0], [0], [1], [0, 0, 1, 1], [], []>} : vector<8x8xbf16>, vector<8x8xbf16>, vector<8x8xf32> -> vector<8x8xf32>
    %238 = arith.truncf %237 : vector<8x8xf32> to vector<8x8xbf16>
    %239 = vector.extract_strided_slice %9 {offsets = [24, 0], sizes = [8, 32], strides = [1, 1]} : vector<32x32xbf16> to vector<8x32xbf16>
    %cst_65 = arith.constant dense<0.000000e+00> : vector<8x32xf32>
    %240 = tpu.matmul %238, %239, %cst_65 {dimension_numbers = #tpu.dot_dimension_numbers<[1], [0], [0], [1], [0, 0, 1, 1], [], []>} : vector<8x8xbf16>, vector<8x32xbf16>, vector<8x32xf32> -> vector<8x32xf32>
    %241 = arith.addf %214, %240 : vector<8x32xf32>
    %242 = tpu.concatenate %125, %241 in 0 : vector<8x32xf32>, vector<8x32xf32> -> vector<16x32xf32>
    %c0_66 = arith.constant 0 : index
    %c0_67 = arith.constant 0 : index
    %243 = vector.load %arg6[%c0_66, %c0_67] : memref<1x32xf32, #tpu.memory_space<vmem>>, vector<1x32xf32>
    %244 = vector.shape_cast %243 : vector<1x32xf32> to vector<32xf32>
    %245 = vector.shape_cast %244 : vector<32xf32> to vector<1x32xf32>
    %246 = vector.broadcast %245 : vector<1x32xf32> to vector<16x32xf32>
    %247 = arith.addf %242, %246 : vector<16x32xf32>
    %248 = arith.addf %0, %247 : vector<16x32xf32>
    %c0_68 = arith.constant 0 : index
    %c0_69 = arith.constant 0 : index
    %249 = vector.load %arg7[%c0_68, %c0_69] : memref<2x32xf32, #tpu.memory_space<vmem>>, vector<1x32xf32>
    %250 = vector.shape_cast %249 : vector<1x32xf32> to vector<32xf32>
    %c1_70 = arith.constant 1 : index
    %c0_71 = arith.constant 0 : index
    %251 = vector.load %arg7[%c1_70, %c0_71] : memref<2x32xf32, #tpu.memory_space<vmem>>, vector<1x32xf32>
    %252 = vector.shape_cast %251 : vector<1x32xf32> to vector<32xf32>
    %cst_72 = arith.constant dense<0.000000e+00> : vector<16xf32>
    %253 = vector.multi_reduction <add>, %248, %cst_72 [1] : vector<16x32xf32> to vector<16xf32>
    %254 = vector.shape_cast %253 : vector<16xf32> to vector<16x1xf32>
    %cst_73 = arith.constant 3.200000e+01 : f32
    %255 = vector.broadcast %cst_73 : f32 to vector<16x1xf32>
    %256 = arith.divf %254, %255 : vector<16x1xf32>
    %257 = vector.broadcast %256 : vector<16x1xf32> to vector<16x32xf32>
    %258 = arith.subf %248, %257 : vector<16x32xf32>
    %259 = arith.mulf %258, %258 : vector<16x32xf32>
    %cst_74 = arith.constant dense<0.000000e+00> : vector<16xf32>
    %260 = vector.multi_reduction <add>, %259, %cst_74 [1] : vector<16x32xf32> to vector<16xf32>
    %261 = vector.shape_cast %260 : vector<16xf32> to vector<16x1xf32>
    %cst_75 = arith.constant 3.200000e+01 : f32
    %262 = vector.broadcast %cst_75 : f32 to vector<16x1xf32>
    %263 = arith.divf %261, %262 : vector<16x1xf32>
    %264 = vector.broadcast %256 : vector<16x1xf32> to vector<16x32xf32>
    %265 = arith.subf %248, %264 : vector<16x32xf32>
    %cst_76 = arith.constant 9.99999974E-6 : f32
    %266 = vector.broadcast %cst_76 : f32 to vector<16x1xf32>
    %267 = arith.addf %263, %266 : vector<16x1xf32>
    %268 = math.rsqrt %267 : vector<16x1xf32>
    %269 = vector.broadcast %268 : vector<16x1xf32> to vector<16x32xf32>
    %270 = arith.mulf %265, %269 : vector<16x32xf32>
    %271 = vector.shape_cast %250 : vector<32xf32> to vector<1x32xf32>
    %272 = vector.broadcast %271 : vector<1x32xf32> to vector<16x32xf32>
    %273 = arith.mulf %270, %272 : vector<16x32xf32>
    %274 = vector.shape_cast %252 : vector<32xf32> to vector<1x32xf32>
    %275 = vector.broadcast %274 : vector<1x32xf32> to vector<16x32xf32>
    %276 = arith.addf %273, %275 : vector<16x32xf32>
    %277 = arith.truncf %276 : vector<16x32xf32> to vector<16x32xbf16>
    %c0_77 = arith.constant 0 : index
    %c0_78 = arith.constant 0 : index
    %278 = vector.load %arg8[%c0_77, %c0_78] : memref<32x128xbf16, #tpu.memory_space<vmem>>, vector<32x128xbf16>
    %cst_79 = arith.constant dense<0.000000e+00> : vector<16x128xf32>
    %279 = tpu.matmul %277, %278, %cst_79 {dimension_numbers = #tpu.dot_dimension_numbers<[1], [0], [0], [1], [0, 0, 1, 1], [], []>} : vector<16x32xbf16>, vector<32x128xbf16>, vector<16x128xf32> -> vector<16x128xf32>
    %c0_80 = arith.constant 0 : index
    %c0_81 = arith.constant 0 : index
    %280 = vector.load %arg9[%c0_80, %c0_81] : memref<1x128xf32, #tpu.memory_space<vmem>>, vector<1x128xf32>
    %281 = vector.shape_cast %280 : vector<1x128xf32> to vector<128xf32>
    %282 = vector.shape_cast %281 : vector<128xf32> to vector<1x128xf32>
    %283 = vector.broadcast %282 : vector<1x128xf32> to vector<16x128xf32>
    %284 = arith.addf %279, %283 : vector<16x128xf32>
    %285 = arith.mulf %284, %284 : vector<16x128xf32>
    %286 = arith.mulf %284, %285 : vector<16x128xf32>
    %cst_82 = arith.constant 4.471500e-02 : f32
    %287 = vector.broadcast %cst_82 : f32 to vector<16x128xf32>
    %288 = arith.mulf %287, %286 : vector<16x128xf32>
    %289 = arith.addf %284, %288 : vector<16x128xf32>
    %cst_83 = arith.constant 0.797884583 : f32
    %290 = vector.broadcast %cst_83 : f32 to vector<16x128xf32>
    %291 = arith.mulf %290, %289 : vector<16x128xf32>
    %292 = math.tanh %291 : vector<16x128xf32>
    %cst_84 = arith.constant 1.000000e+00 : f32
    %293 = vector.broadcast %cst_84 : f32 to vector<16x128xf32>
    %294 = arith.addf %293, %292 : vector<16x128xf32>
    %cst_85 = arith.constant 5.000000e-01 : f32
    %295 = vector.broadcast %cst_85 : f32 to vector<16x128xf32>
    %296 = arith.mulf %295, %294 : vector<16x128xf32>
    %297 = arith.mulf %284, %296 : vector<16x128xf32>
    %298 = arith.truncf %297 : vector<16x128xf32> to vector<16x128xbf16>
    %c0_86 = arith.constant 0 : index
    %c0_87 = arith.constant 0 : index
    %299 = vector.load %arg10[%c0_86, %c0_87] : memref<128x32xbf16, #tpu.memory_space<vmem>>, vector<128x32xbf16>
    %cst_88 = arith.constant dense<0.000000e+00> : vector<16x32xf32>
    %300 = tpu.matmul %298, %299, %cst_88 {dimension_numbers = #tpu.dot_dimension_numbers<[1], [0], [0], [1], [0, 0, 1, 1], [], []>} : vector<16x128xbf16>, vector<128x32xbf16>, vector<16x32xf32> -> vector<16x32xf32>
    %c0_89 = arith.constant 0 : index
    %c0_90 = arith.constant 0 : index
    %301 = vector.load %arg11[%c0_89, %c0_90] : memref<1x32xf32, #tpu.memory_space<vmem>>, vector<1x32xf32>
    %302 = vector.shape_cast %301 : vector<1x32xf32> to vector<32xf32>
    %303 = vector.shape_cast %302 : vector<32xf32> to vector<1x32xf32>
    %304 = vector.broadcast %303 : vector<1x32xf32> to vector<16x32xf32>
    %305 = arith.addf %300, %304 : vector<16x32xf32>
    %306 = arith.addf %276, %305 : vector<16x32xf32>
    %c0_91 = arith.constant 0 : index
    %c0_92 = arith.constant 0 : index
    %307 = vector.load %arg12[%c0_91, %c0_92] : memref<2x32xf32, #tpu.memory_space<vmem>>, vector<1x32xf32>
    %308 = vector.shape_cast %307 : vector<1x32xf32> to vector<32xf32>
    %c1_93 = arith.constant 1 : index
    %c0_94 = arith.constant 0 : index
    %309 = vector.load %arg12[%c1_93, %c0_94] : memref<2x32xf32, #tpu.memory_space<vmem>>, vector<1x32xf32>
    %310 = vector.shape_cast %309 : vector<1x32xf32> to vector<32xf32>
    %cst_95 = arith.constant dense<0.000000e+00> : vector<16xf32>
    %311 = vector.multi_reduction <add>, %306, %cst_95 [1] : vector<16x32xf32> to vector<16xf32>
    %312 = vector.shape_cast %311 : vector<16xf32> to vector<16x1xf32>
    %cst_96 = arith.constant 3.200000e+01 : f32
    %313 = vector.broadcast %cst_96 : f32 to vector<16x1xf32>
    %314 = arith.divf %312, %313 : vector<16x1xf32>
    %315 = vector.broadcast %314 : vector<16x1xf32> to vector<16x32xf32>
    %316 = arith.subf %306, %315 : vector<16x32xf32>
    %317 = arith.mulf %316, %316 : vector<16x32xf32>
    %cst_97 = arith.constant dense<0.000000e+00> : vector<16xf32>
    %318 = vector.multi_reduction <add>, %317, %cst_97 [1] : vector<16x32xf32> to vector<16xf32>
    %319 = vector.shape_cast %318 : vector<16xf32> to vector<16x1xf32>
    %cst_98 = arith.constant 3.200000e+01 : f32
    %320 = vector.broadcast %cst_98 : f32 to vector<16x1xf32>
    %321 = arith.divf %319, %320 : vector<16x1xf32>
    %322 = vector.broadcast %314 : vector<16x1xf32> to vector<16x32xf32>
    %323 = arith.subf %306, %322 : vector<16x32xf32>
    %cst_99 = arith.constant 9.99999974E-6 : f32
    %324 = vector.broadcast %cst_99 : f32 to vector<16x1xf32>
    %325 = arith.addf %321, %324 : vector<16x1xf32>
    %326 = math.rsqrt %325 : vector<16x1xf32>
    %327 = vector.broadcast %326 : vector<16x1xf32> to vector<16x32xf32>
    %328 = arith.mulf %323, %327 : vector<16x32xf32>
    %329 = vector.shape_cast %308 : vector<32xf32> to vector<1x32xf32>
    %330 = vector.broadcast %329 : vector<1x32xf32> to vector<16x32xf32>
    %331 = arith.mulf %328, %330 : vector<16x32xf32>
    %332 = vector.shape_cast %310 : vector<32xf32> to vector<1x32xf32>
    %333 = vector.broadcast %332 : vector<1x32xf32> to vector<16x32xf32>
    %334 = arith.addf %331, %333 : vector<16x32xf32>
    %335 = arith.truncf %334 : vector<16x32xf32> to vector<16x32xbf16>
    %c0_100 = arith.constant 0 : index
    %c0_101 = arith.constant 0 : index
    %336 = vector.load %arg13[%c0_100, %c0_101] : memref<32x128xbf16, #tpu.memory_space<vmem>>, vector<32x128xbf16>
    %cst_102 = arith.constant dense<0.000000e+00> : vector<16x128xf32>
    %337 = tpu.matmul %335, %336, %cst_102 {dimension_numbers = #tpu.dot_dimension_numbers<[1], [0], [0], [1], [0, 0, 1, 1], [], []>} : vector<16x32xbf16>, vector<32x128xbf16>, vector<16x128xf32> -> vector<16x128xf32>
    %c0_103 = arith.constant 0 : index
    %c0_104 = arith.constant 0 : index
    %338 = vector.load %arg14[%c0_103, %c0_104] : memref<1x128xf32, #tpu.memory_space<vmem>>, vector<1x128xf32>
    %339 = vector.shape_cast %338 : vector<1x128xf32> to vector<128xf32>
    %340 = vector.shape_cast %339 : vector<128xf32> to vector<1x128xf32>
    %341 = vector.broadcast %340 : vector<1x128xf32> to vector<16x128xf32>
    %342 = arith.addf %337, %341 : vector<16x128xf32>
    %c0_105 = arith.constant 0 : index
    %c0_106 = arith.constant 0 : index
    %343 = vector.load %arg15[%c0_105, %c0_106] : memref<16x128xf32, #tpu.memory_space<vmem>>, vector<16x128xf32>
    tpu.vector_store %arg15[%c0_105, %c0_106], %342 {strides = array<i32>} : memref<16x128xf32, #tpu.memory_space<vmem>>, vector<16x128xf32>,
    return
  }
  func.func @transform_0(%arg0: i32) -> (i32, i32) {
    %c0_i32 = arith.constant 0 : i32
    %c0_i32_0 = arith.constant 0 : i32
    return %arg0, %c0_i32 : i32, i32
  }
  func.func @transform_1(%arg0: i32) -> (i32, i32, i32) {
    %c0_i32 = arith.constant 0 : i32
    %c0_i32_0 = arith.constant 0 : i32
    %c0_i32_1 = arith.constant 0 : i32
    return %arg0, %c0_i32, %c0_i32_0 : i32, i32, i32
  }
  func.func @transform_2(%arg0: i32) -> (i32, i32) {
    %c0_i32 = arith.constant 0 : i32
    %c0_i32_0 = arith.constant 0 : i32
    %c0_i32_1 = arith.constant 0 : i32
    return %c0_i32, %c0_i32_0 : i32, i32
  }
  func.func @transform_3(%arg0: i32) -> (i32, i32) {
    %c0_i32 = arith.constant 0 : i32
    %c0_i32_0 = arith.constant 0 : i32
    %c0_i32_1 = arith.constant 0 : i32
    return %c0_i32, %c0_i32_0 : i32, i32
  }
  func.func @transform_4(%arg0: i32) -> (i32, i32) {
    %c0_i32 = arith.constant 0 : i32
    %c0_i32_0 = arith.constant 0 : i32
    %c0_i32_1 = arith.constant 0 : i32
    return %c0_i32, %c0_i32_0 : i32, i32
  }
  func.func @transform_5(%arg0: i32) -> (i32, i32) {
    %c0_i32 = arith.constant 0 : i32
    %c0_i32_0 = arith.constant 0 : i32
    %c0_i32_1 = arith.constant 0 : i32
    return %c0_i32, %c0_i32_0 : i32, i32
  }
  func.func @transform_6(%arg0: i32) -> (i32, i32) {
    %c0_i32 = arith.constant 0 : i32
    %c0_i32_0 = arith.constant 0 : i32
    %c0_i32_1 = arith.constant 0 : i32
    return %c0_i32, %c0_i32_0 : i32, i32
  }
  func.func @transform_7(%arg0: i32) -> (i32, i32) {
    %c0_i32 = arith.constant 0 : i32
    %c0_i32_0 = arith.constant 0 : i32
    %c0_i32_1 = arith.constant 0 : i32
    return %c0_i32, %c0_i32_0 : i32, i32
  }
  func.func @transform_8(%arg0: i32) -> (i32, i32) {
    %c0_i32 = arith.constant 0 : i32
    %c0_i32_0 = arith.constant 0 : i32
    %c0_i32_1 = arith.constant 0 : i32
    return %c0_i32, %c0_i32_0 : i32, i32
  }
  func.func @transform_9(%arg0: i32) -> (i32, i32) {
    %c0_i32 = arith.constant 0 : i32
    %c0_i32_0 = arith.constant 0 : i32
    %c0_i32_1 = arith.constant 0 : i32
    return %c0_i32, %c0_i32_0 : i32, i32
  }
  func.func @transform_10(%arg0: i32) -> (i32, i32) {
    %c0_i32 = arith.constant 0 : i32
    %c0_i32_0 = arith.constant 0 : i32
    %c0_i32_1 = arith.constant 0 : i32
    return %c0_i32, %c0_i32_0 : i32, i32
  }
  func.func @transform_11(%arg0: i32) -> (i32, i32) {
    %c0_i32 = arith.constant 0 : i32
    %c0_i32_0 = arith.constant 0 : i32
    %c0_i32_1 = arith.constant 0 : i32
    return %c0_i32, %c0_i32_0 : i32, i32
  }
  func.func @transform_12(%arg0: i32) -> (i32, i32) {
    %c0_i32 = arith.constant 0 : i32
    %c0_i32_0 = arith.constant 0 : i32
    %c0_i32_1 = arith.constant 0 : i32
    return %c0_i32, %c0_i32_0 : i32, i32
  }
  func.func @transform_13(%arg0: i32) -> (i32, i32) {
    %c0_i32 = arith.constant 0 : i32
    %c0_i32_0 = arith.constant 0 : i32
    %c0_i32_1 = arith.constant 0 : i32
    return %c0_i32, %c0_i32_0 : i32, i32
  }
  func.func @transform_14(%arg0: i32) -> (i32, i32) {
    %c0_i32 = arith.constant 0 : i32
    %c0_i32_0 = arith.constant 0 : i32
    return %arg0, %c0_i32 : i32, i32
  }
}

</mosaic_0001>

<bundles_post_ra>
// kernel: tpu_custom_call.1
= control target key start
LH: loop header
LB: loop body
LE: loop exit
PB: predicated region body
PF: predicated region fallthrough
CT: control target
= control target key end

     0   :  { %19 = vsyncpa [#allocation3], 0  ;;  %s2869_s0 = inlined_call_operand.vmem [shape: f32[16,32], index: 0, kind: input, shape index: {}]   ;;  %s2870_s1 = inlined_call_operand.hbm [shape: f32[2,1,8], index: 1, kind: input, shape index: {}]   ;;  %s2871_s2 = inlined_call_operand.vmem [shape: bf16[32,96], index: 2, kind: input, shape index: {}]   ;;  %s2872_s3 = inlined_call_operand.hbm [shape: f32[1,96], index: 3, kind: input, shape index: {}]   ;;  %s2873_s4 = inlined_call_operand.vmem [shape: bf16[32,32], index: 4, kind: input, shape index: {}]   ;;  %s2874_s5 = inlined_call_operand.hbm [shape: f32[1,32], index: 5, kind: input, shape index: {}]   ;;  %s2875_s6 = inlined_call_operand.hbm [shape: f32[2,32], index: 6, kind: input, shape index: {}]   ;;  %s2876_s7 = inlined_call_operand.vmem [shape: bf16[32,128], index: 7, kind: input, shape index: {}]   ;;  %s2877_s8 = inlined_call_operand.hbm [shape: f32[1,128], index: 8, kind: input, shape index: {}]   ;;  %s2878_s9 = inlined_call_operand.vmem [shape: bf16[128,32], index: 9, kind: input, shape index: {}]   ;;  %s2879_s10 = inlined_call_operand.hbm [shape: f32[1,32], index: 10, kind: input, shape index: {}]   ;;  %s2880_s11 = inlined_call_operand.vmem [shape: f32[2,32], index: 11, kind: input, shape index: {}]   ;;  %s2881_s12 = inlined_call_operand.vmem [shape: bf16[32,128], index: 12, kind: input, shape index: {}]   ;;  %s2882_s13 = inlined_call_operand.vmem [shape: f32[1,128], index: 13, kind: input, shape index: {}]   ;;  %s2883_s14 = inlined_call_operand.hbm [shape: f32[16,128], index: 14, kind: output, shape index: {}]  }
   0x1   :  { %20 = vsyncpa [#allocation6], 0 }
   0x2   :  { %21 = vsyncpa [#allocation9], 0 }
   0x3   :  { %22 = vsyncpa [#allocation12], 0 }
   0x4   :  { %23 = vsyncpa [#allocation4], 0  ;;  %s2402_s29 = smov [#allocation5]   ;;  %s2403_s15 = smov [#allocation8]  }
   0x5   :  { %s46_s30 = sshll.u32 %s2402_s29, 4  ;;  %s68_s16 = sshll.u32 %s2403_s15, 4  ;;  %s47_s30 = int_to_ptr.vmem [resolvable:$true] %s46_s30  ;;  %s69_s16 = int_to_ptr.vmem [resolvable:$true] %s68_s16 }
   0x6   :  { %s2260_s17 = scalar_lea.vmem %s47_s30, 16  ;;  %s2264_s18 = scalar_lea.vmem %s47_s30, 32 }
   0x7   :  { %p2261_p0 = scmp.ne.s32.totalorder %s47_s30, %s2260_s17  ;;  %p2265_p1 = scmp.lt.s32.totalorder %s47_s30, %s47_s30 }
   0x8   :  { %p2266_p2 = scmp.lt.s32.totalorder %s2264_s18, %s2260_s17 }
   0xa   :  { %p2267_p3 = por %p2266_p2, %p2265_p1 }
   0xc   :  { %p2268_p4 = pnand %p2267_p3, %p2261_p0 }
   0xe   :  { %2271 = shalt.err (!%p2268_p4)
}
   0xf   :  { %49 = dma.hbm_to_vmem [thread:$0]  %s2872_s3, 16, %s47_s30, [#allocation6]  }
  0x10   :  { %s2280_s21 = scalar_lea.vmem %s69_s16, 32  ;;  %p2285_p6 = scmp.lt.s32.totalorder %s69_s16, %s69_s16 }
  0x11   :  { %p2281_p5 = scmp.ne.s32.totalorder %s69_s16, %s2280_s21  ;;  %p2286_p7 = scmp.lt.s32.totalorder %s2280_s21, %s2280_s21 }
  0x13   :  { %p2287_p8 = por %p2286_p7, %p2285_p6 }
  0x15   :  { %p2288_p9 = pnand %p2287_p8, %p2281_p5 }
  0x17   :  { %2291 = shalt.err (!%p2288_p9)
}
  0x18   :  { %71 = dma.hbm_to_vmem [thread:$0]  %s2875_s6, 32, %s69_s16, [#allocation9]  }
  0x19   :  { %s2404_s24 = smov [#allocation2]  }
  0x1a   :  { %s31_s25 = sshll.u32 %s2404_s24, 4  ;;  %s32_s25 = int_to_ptr.vmem [resolvable:$true] %s31_s25 }
  0x1b   :  { %s2300_s26 = scalar_lea.vmem %s32_s25, 32  ;;  %p2305_p11 = scmp.lt.s32.totalorder %s32_s25, %s32_s25 }
  0x1c   :  { %p2301_p10 = scmp.ne.s32.totalorder %s32_s25, %s2300_s26  ;;  %p2306_p12 = scmp.lt.s32.totalorder %s2300_s26, %s2300_s26 }
  0x1e   :  { %p2307_p13 = por %p2306_p12, %p2305_p11 }
  0x20   :  { %p2308_p0 = pnand %p2307_p13, %p2301_p10 }
  0x22   :  { %2311 = shalt.err (!%p2308_p0)
}
  0x23   :  { %s2405_s3 = smov 16   ;;  %s2406_s27 = smov 1  }
  0x24   :  { %37 = dma.hbm_to_vmem [thread:$0]  %s2870_s1, 32, %s32_s25, [#allocation3], %s2405_s3, %s2405_s3, %s2406_s27  }
  0x25   :  { %s2407_s30 = smov [#allocation7]   ;;  %s2408_s6 = smov [#allocation10]  }
  0x26   :  { %s58_s15 = sshll.u32 %s2407_s30, 4  ;;  %s80_s16 = sshll.u32 %s2408_s6, 4  ;;  %s59_s15 = int_to_ptr.vmem [resolvable:$true] %s58_s15  ;;  %s81_s16 = int_to_ptr.vmem [resolvable:$true] %s80_s16 }
  0x27   :  { %s2320_s17 = scalar_lea.vmem %s59_s15, 16  ;;  %s2324_s18 = scalar_lea.vmem %s59_s15, 32 }
  0x28   :  { %p2321_p1 = scmp.ne.s32.totalorder %s59_s15, %s2320_s17  ;;  %p2325_p2 = scmp.lt.s32.totalorder %s59_s15, %s59_s15 }
  0x29   :  { %p2326_p3 = scmp.lt.s32.totalorder %s2324_s18, %s2320_s17 }
  0x2b   :  { %p2327_p4 = por %p2326_p3, %p2325_p2 }
  0x2d   :  { %p2328_p5 = pnand %p2327_p4, %p2321_p1 }
  0x2f   :  { %2331 = shalt.err (!%p2328_p5)
}
  0x30   :  { %61 = dma.hbm_to_vmem [thread:$0]  %s2874_s5, 16, %s59_s15, [#allocation6]  }
  0x31   :  { %s2340_s21 = scalar_lea.vmem %s81_s16, 16  ;;  %s2344_s1 = scalar_lea.vmem %s81_s16, 32 }
  0x32   :  { %p2341_p6 = scmp.ne.s32.totalorder %s81_s16, %s2340_s21  ;;  %p2345_p7 = scmp.lt.s32.totalorder %s81_s16, %s81_s16 }
  0x33   :  { %p2346_p8 = scmp.lt.s32.totalorder %s2344_s1, %s2340_s21 }
  0x35   :  { %p2347_p9 = por %p2346_p8, %p2345_p7 }
  0x37   :  { %p2348_p10 = pnand %p2347_p9, %p2341_p6 }
  0x39   :  { %2351 = shalt.err (!%p2348_p10)
}
  0x3a   :  { %83 = dma.hbm_to_vmem [thread:$0]  %s2877_s8, 16, %s81_s16, [#allocation9]  }
  0x3b   :  { %s2409_s24 = smov [#allocation11]  }
  0x3c   :  { %s92_s25 = sshll.u32 %s2409_s24, 4  ;;  %s93_s25 = int_to_ptr.vmem [resolvable:$true] %s92_s25 }
  0x3d   :  { %s2360_s26 = scalar_lea.vmem %s93_s25, 16  ;;  %s2364_s3 = scalar_lea.vmem %s93_s25, 32 }
  0x3e   :  { %p2361_p11 = scmp.ne.s32.totalorder %s93_s25, %s2360_s26  ;;  %p2365_p12 = scmp.lt.s32.totalorder %s93_s25, %s93_s25 }
  0x3f   :  { %p2366_p13 = scmp.lt.s32.totalorder %s2364_s3, %s2360_s26 }
  0x41   :  { %p2367_p0 = por %p2366_p13, %p2365_p12 }
  0x43   :  { %p2368_p1 = pnand %p2367_p0, %p2361_p11 }
  0x45   :  { %2371 = shalt.err (!%p2368_p1)
}
  0x46   :  { %95 = dma.hbm_to_vmem [thread:$0]  %s2879_s10, 16, %s93_s25, [#allocation12]  }
  0x47   :  { %2392 = dma.done.wait [#allocation3], 32  }
  0x48   :  { %2393 = vsyncadd [#allocation3], 4294967264 }
  0x49   :  { %2394 = dma.done.wait [#allocation6], 32  }
  0x4a   :  { %2395 = vsyncadd [#allocation6], 4294967264 }
  0x4b   :  { %2396 = dma.done.wait [#allocation9], 48  }
  0x4c   :  { %2397 = vsyncadd [#allocation9], 4294967248 }
  0x4d   :  { %2398 = dma.done.wait [#allocation12], 16  }
  0x4e   :  { %2399 = vsyncadd [#allocation12], 4294967280  ;;  %v2410_v0 = vmov 0.0   ;;  %vm2411_vm0 = vmmov 0   ;;  %v2194_v1 = vld [vmem:[%s2871_s2 + $0x8] sm:$0xff]   ;;  %v2195_v2 = vld [vmem:[%s2871_s2] sm:$0xff]   ;;  %v252_v19 = vlaneseq }
  0x4f   :  { %1982 = vmatprep.subr.bf16.mxu1 %v2410_v0  ;;  %1986 = vmatprep.mubr.msk.bf16.mxu1 %vm2411_vm0, %v2410_v0  ;;  %v2534_v3 = vld [vmem:[%s2869_s0] sm:$0xff]  ;;  %v2539_v4 = vld [vmem:[%s2869_s0 + $0x8] sm:$0xff]  ;;  %vm147_vm1 = vcmask 261120   ;;  %s2412_s0 = smov 120   ;;  %s2413_s2 = smov 96   ;;  %vm203_vm2 = vcmask 64512  }
  0x50   :  { %1996 = vmatprep.subr.bf16.mxu0 %v2410_v0  ;;  %1998 = vmatprep.mubr.msk.bf16.mxu0 %vm2411_vm0, %v2410_v0  ;;  %v123_v5 = vpack.c.bf16 %v2539_v4, %v2534_v3  ;;  %v1864_v6 = vld [vmem:[#allocation5] ss:$0 sm:$0xff]  ;;  %s2414_s17 = smov 88   ;;  %v196_v20 = vld [vmem:[#allocation2] sm:$0x1]  ;;  %v2569_v22 = vshrl.u32 %v252_v19, 7 }
  0x51   :  { %1983 = vmatpush3.bf16.msra.mxu1 %v2194_v1  ;;  %v1868_v21 = vadd.f32 -1.0, %v196_v20  ;;  %s2415_s18 = smov 64   ;;  %s2416_s19 = smov 56   ;;  %vm275_vm3 = vcmask 1043456   ;;  %v192_v62 = vld [vmem:[%s2873_s4] sm:$0xf] }
  0x52   :  { %1984 = vmatprep.subr.bf16.mxu1 %v2410_v0  ;;  %v254_v24 = vsub.s32 0, %v2569_v22  ;;  %s2417_s20 = smov 112   ;;  %s2418_s21 = smov 80   ;;  %v2604_v63 = vsel %vm275_vm3, %v192_v62, 0  ;;  %v193_v1 = vld [vmem:[%s2873_s4 + $0x4] sm:$0xf] }
  0x53   :  { %v198_v23 = vmul.f32 1e+09, %v1868_v21  ;;  %s2419_s25 = smov 72   ;;  %s2420_s26 = smov 104  }
  0x54   :  { %s2421_s3 = smov 48   ;;  %s2422_s8 = smov 40  }
  0x55   :  { %1985 = vmatpush3.bf16.msra.mxu1 %v2195_v2  ;;  %v2574_v25 = vrot.slane %v198_v23, %v254_v24  ;;  %v2612_v2 = vsel %vm275_vm3, %v193_v1, 0  ;;  %s2423_s30 = smov [#allocation13]  }
  0x56   :  { %1990 = vmatprep.subr.bf16.mxu1 %v2410_v0  ;;  %s1849_s15 = sshll.u32 %s2423_s30, 4  ;;  %s1850_s15 = int_to_ptr.vmem [resolvable:$true] %s1849_s15 }
  0x57   :  { %p2377_p3 = scmp.lt.s32.totalorder %s1850_s15, %s1850_s15 }
  0x58   :  { %1987 = vmatmul.mubr.msk.bf16.vlgmr.msra.gmra.mxu1 %vm147_vm1, %v123_v5 }
  0x59   :  { %1992 = vmatprep.mubr.msk.bf16.mxu1 %vm2411_vm0, %v2410_v0 }
 0x118   :  { %v185_v7 = vpop.f32.mrf.mxu1 }
 0x119   :  { %v186_v8 = vadd.f32 %v1864_v6, %v185_v7 }
 0x11a   :  { %v1988_v9 = vpop.f32.mrf.mxu1 }
 0x11b   :  { %v2548_v10 = vpack.c.bf16 %v186_v8, %v186_v8 }
 0x11c   :  { %v188_v11 = vpop.f32.mrf.mxu1 }
 0x11d   :  { %v2550_v12 = vadd.f32 %v1864_v6, %v188_v11  ;;  %320 = vrot.lane.b32.xlu1 %v2548_v10, %s2412_s0  ;;  %201 = vrot.lane.b32.xlu0 %v2548_v10, %s2413_s2 }
 0x11e   :  { %v1989_v13 = vpop.f32.mrf.mxu1 }
 0x121   :  { %322 = vrot.lane.b32.xlu0 %v2548_v10, %s2414_s17 }
 0x18f   :  { %v202_v14 = vpop.permute.xlu0 %201  ;;  %v321_v18 = vpop.permute.xlu1 %320 }
 0x190   :  { %v208_v15 = vsel %vm203_vm2, %v202_v14, 0 }
 0x191   :  { %1991 = vmatpush3.bf16.xpose.msra.mxu1 %v208_v15 }
 0x192   :  { %2002 = vmatprep.subr.bf16.mxu1 %v2410_v0 }
 0x193   :  { %v323_v16 = vpop.permute.xlu0 %322 }
 0x194   :  { %v328_v17 = vsel %vm203_vm2, %v323_v16, 0 }
 0x198   :  { %1993 = vmatmul.mubr.msk.bf16.vlgmr.msra.gmra.mxu1 %vm203_vm2, %v2548_v10 }
 0x199   :  { %2003 = vmatpush3.bf16.xpose.msra.mxu1 %v328_v17  ;;  %2004 = vmatprep.mubr.msk.bf16.mxu1 %vm2411_vm0, %v2410_v0 }
 0x19a   :  { %2014 = vmatprep.subr.bf16.mxu1 %v2410_v0 }
 0x1a0   :  { %2005 = vmatmul.mubr.msk.bf16.vlgmr.msra.gmra.mxu1 %vm203_vm2, %v321_v18 }
 0x1a1   :  { %2016 = vmatprep.mubr.msk.bf16.mxu1 %vm2411_vm0, %v2410_v0  ;;  %2015 = vmatpush3.bf16.msra.mxu1 %v2612_v2 }
 0x1a2   :  { %2026 = vmatprep.subr.bf16.mxu1 %v2410_v0 }
 0x258   :  { %v244_v26 = vpop.f32.mrf.mxu1 }
 0x259   :  { %v250_v27 = vmul.f32 0.35355338, %v244_v26 }
 0x25a   :  { %v1994_v28 = vpop.f32.mrf.mxu1 }
 0x25b   :  { %v257_v29 = vadd.f32 %v2574_v25, %v250_v27 }
 0x25c   :  { %v247_v30 = vpop.f32.mrf.mxu1 }
 0x25d   :  { %v258_v31 = vsel %vm203_vm2, %v257_v29, -inf }
 0x25e   :  { %259 = vmax.xlane.f32.xlu1 %v258_v31  ;;  %v1995_v32 = vpop.f32.mrf.mxu1 }
 0x260   :  { %v364_v33 = vpop.f32.mrf.mxu1 }
 0x261   :  { %v370_v34 = vmul.f32 0.35355338, %v364_v33 }
 0x262   :  { %v2006_v35 = vpop.f32.mrf.mxu1 }
 0x263   :  { %v371_v36 = vadd.f32 %v370_v34, %v2574_v25 }
 0x264   :  { %v367_v37 = vpop.f32.mrf.mxu1 }
 0x265   :  { %v372_v38 = vsel %vm203_vm2, %v371_v36, -inf }
 0x266   :  { %373 = vmax.xlane.f32.xlu0 %v372_v38  ;;  %v2007_v39 = vpop.f32.mrf.mxu1 }
 0x2e7   :  { %v260_v40 = vpop.xlane.xlu1 %259 }
 0x2e8   :  { %v261_v41 = vsub.f32 %v257_v29, %v260_v40 }
 0x2ea   :  { %v262_v42 = vmul.f32 1.442695, %v261_v41 }
 0x2ec   :  { %2208 = vpow2.f32 %v262_v42 }
 0x2ef   :  { %v374_v43 = vpop.xlane.xlu0 %373 }
 0x2f0   :  { %v375_v44 = vsub.f32 %v371_v36, %v374_v43 }
 0x2f2   :  { %v376_v45 = vmul.f32 1.442695, %v375_v44 }
 0x2f4   :  { %2210 = vpow2.f32 %v376_v45 }
 0x2f9   :  { %v2209_v46 = vpop.eup %2208 }
 0x2fa   :  { %v264_v47 = vsel %vm203_vm2, %v2209_v46, 0.0 }
 0x2fb   :  { %265 = vadd.xlane.f32.xlu0 %v264_v47 }
 0x301   :  { %v2211_v48 = vpop.eup %2210 }
 0x302   :  { %v378_v49 = vsel %vm203_vm2, %v2211_v48, 0.0 }
 0x303   :  { %379 = vadd.xlane.f32.xlu1 %v378_v49 }
 0x311   :  { %270 = vrot.lane.b32.xlu0 %v2548_v10, %s2415_s18 }
 0x314   :  { %384 = vrot.lane.b32.xlu1 %v2548_v10, %s2416_s19 }
 0x315   :  { %525 = vrot.lane.b32.xlu0 %v2548_v10, %s2417_s20 }
 0x318   :  { %527 = vrot.lane.b32.xlu1 %v2548_v10, %s2418_s21 }
 0x384   :  { %v266_v50 = vpop.xlane.xlu0 %265 }
 0x385   :  { %2212 = vrcp.f32 %v266_v50 }
 0x388   :  { %v271_v51 = vpop.permute.xlu0 %270 }
 0x389   :  { %v277_v52 = vsel %vm275_vm3, %v271_v51, 0 }
 0x38a   :  { %1997 = vmatpush3.bf16.msra.mxu0 %v277_v52 }
 0x38b   :  { %2008 = vmatprep.subr.bf16.mxu0 %v2410_v0 }
 0x38c   :  { %v380_v53 = vpop.xlane.xlu1 %379  ;;  %v526_v19 = vpop.permute.xlu0 %525 }
 0x38d   :  { %2214 = vrcp.f32 %v380_v53  ;;  %v194_v53 = vld [vmem:[%s2873_s4 + $0x8] sm:$0xf] }
 0x390   :  { %v385_v56 = vpop.permute.xlu1 %384 }
 0x391   :  { %v390_v58 = vsel %vm275_vm3, %v385_v56, 0 }
 0x392   :  { %v2213_v54 = vpop.eup %2212 }
 0x393   :  { %v268_v55 = vmul.f32 %v2213_v54, %v2209_v46  ;;  %v2652_v54 = vsel %vm275_vm3, %v194_v53, 0 }
 0x394   :  { %v528_v11 = vpop.permute.xlu1 %527 }
 0x395   :  { %v269_v57 = vpack.c.bf16 %v268_v55, %v268_v55  ;;  %v533_v16 = vsel %vm203_vm2, %v528_v11, 0 }
 0x397   :  { %1999 = vmatmul.mubr.msk.bf16.vlgmr.msra.gmra.mxu0 %vm203_vm2, %v269_v57 }
 0x398   :  { %2009 = vmatpush3.bf16.msra.mxu0 %v390_v58  ;;  %2010 = vmatprep.mubr.msk.bf16.mxu0 %vm2411_vm0, %v2410_v0 }
 0x399   :  { %2020 = vmatprep.subr.bf16.mxu0 %v2410_v0 }
 0x39a   :  { %v2215_v59 = vpop.eup %2214 }
 0x39b   :  { %v382_v60 = vmul.f32 %v2215_v59, %v2211_v48 }
 0x39d   :  { %v383_v61 = vpack.c.bf16 %v382_v60, %v382_v60 }
 0x39f   :  { %2011 = vmatmul.mubr.msk.bf16.vlgmr.msra.gmra.mxu0 %vm203_vm2, %v383_v61 }
 0x3a0   :  { %2022 = vmatprep.mubr.msk.bf16.mxu0 %vm2411_vm0, %v2410_v0  ;;  %2021 = vmatpush3.bf16.msra.mxu0 %v2604_v63 }
 0x3a1   :  { %2032 = vmatprep.subr.bf16.mxu0 %v2410_v0 }
 0x457   :  { %v313_v5 = vpop.f32.mrf.mxu0 }
 0x458   :  { %v319_v6 = vpack.c.bf16 %v313_v5, %v313_v5 }
 0x459   :  { %v2000_v7 = vpop.f32.mrf.mxu0 }
 0x45a   :  { %2023 = vmatmul.mubr.msk.bf16.vlgmr.msra.gmra.mxu0 %vm203_vm2, %v319_v6 }
 0x45b   :  { %v316_v8 = vpop.f32.mrf.mxu0  ;;  %2034 = vmatprep.mubr.msk.bf16.mxu0 %vm2411_vm0, %v2410_v0 }
 0x45c   :  { %v2665_v8 = vpack.c.bf16 %v2550_v12, %v2550_v12 }
 0x45d   :  { %v2001_v9 = vpop.f32.mrf.mxu0 }
 0x45f   :  { %v426_v13 = vpop.f32.mrf.mxu0 }
 0x460   :  { %v432_v14 = vpack.c.bf16 %v426_v13, %v426_v13 }
 0x461   :  { %v2012_v15 = vpop.f32.mrf.mxu0 }
 0x462   :  { %2017 = vmatmul.mubr.msk.bf16.vlgmr.msra.gmra.mxu1 %vm203_vm2, %v432_v14 }
 0x463   :  { %2027 = vmatpush3.bf16.xpose.msra.mxu1 %v533_v16  ;;  %v429_v17 = vpop.f32.mrf.mxu0  ;;  %2028 = vmatprep.mubr.msk.bf16.mxu1 %vm2411_vm0, %v2410_v0 }
 0x464   :  { %2038 = vmatprep.subr.bf16.mxu1 %v2410_v0 }
 0x465   :  { %v2013_v18 = vpop.f32.mrf.mxu0 }
 0x46a   :  { %2029 = vmatmul.mubr.msk.bf16.vlgmr.msra.gmra.mxu1 %vm203_vm2, %v526_v19 }
 0x46b   :  { %2040 = vmatprep.mubr.msk.bf16.mxu1 %vm2411_vm0, %v2410_v0  ;;  %2039 = vmatpush3.bf16.msra.mxu1 %v2652_v54 }
 0x46c   :  { %2050 = vmatprep.subr.bf16.mxu1 %v2410_v0 }
 0x51a   :  { %v519_v20 = vpop.f32.mrf.mxu0 }
 0x51c   :  { %v2024_v21 = vpop.f32.mrf.mxu0 }
 0x51e   :  { %v522_v23 = vpop.f32.mrf.mxu0 }
 0x520   :  { %v2025_v26 = vpop.f32.mrf.mxu0 }
 0x522   :  { %v473_v27 = vpop.f32.mrf.mxu1 }
 0x523   :  { %v2627_v28 = vadd.f32 %v519_v20, %v473_v27 }
 0x524   :  { %v2018_v29 = vpop.f32.mrf.mxu1 }
 0x526   :  { %v476_v30 = vpop.f32.mrf.mxu1 }
 0x528   :  { %v2019_v31 = vpop.f32.mrf.mxu1 }
 0x52a   :  { %v569_v32 = vpop.f32.mrf.mxu1 }
 0x52b   :  { %v575_v33 = vmul.f32 0.35355338, %v569_v32  ;;  %v195_v32 = vld [vmem:[%s2873_s4 + $0xc] sm:$0xf] }
 0x52c   :  { %v2030_v34 = vpop.f32.mrf.mxu1 }
 0x52d   :  { %v576_v35 = vadd.f32 %v575_v33, %v2574_v25  ;;  %v2699_v33 = vsel %vm275_vm3, %v195_v32, 0  ;;  %v846_v34 = vld [vmem:[#allocation2 + $0x1] sm:$0x1] }
 0x52e   :  { %v572_v36 = vpop.f32.mrf.mxu1 }
 0x52f   :  { %v577_v37 = vsel %vm203_vm2, %v576_v35, -inf }
 0x530   :  { %578 = vmax.xlane.f32.xlu1 %v577_v37  ;;  %v2031_v38 = vpop.f32.mrf.mxu1 }
 0x541   :  { %687 = vrot.lane.b32.xlu1 %v2548_v10, %s2419_s25 }
 0x545   :  { %685 = vrot.lane.b32.xlu1 %v2548_v10, %s2420_s26 }
 0x5b9   :  { %v579_v39 = vpop.xlane.xlu1 %578 }
 0x5ba   :  { %v580_v40 = vsub.f32 %v576_v35, %v579_v39  ;;  %v1881_v35 = vadd.f32 -1.0, %v846_v34 }
 0x5bc   :  { %v581_v41 = vmul.f32 1.442695, %v580_v40  ;;  %v848_v38 = vmul.f32 1e+09, %v1881_v35 }
 0x5bd   :  { %v688_v49 = vpop.permute.xlu1 %687 }
 0x5be   :  { %2216 = vpow2.f32 %v581_v41  ;;  %v693_v51 = vsel %vm203_vm2, %v688_v49, 0  ;;  %v2708_v41 = vrot.slane %v848_v38, %v254_v24 }
 0x5c1   :  { %v686_v52 = vpop.permute.xlu1 %685 }
 0x5cb   :  { %v2217_v42 = vpop.eup %2216 }
 0x5cc   :  { %v583_v43 = vsel %vm203_vm2, %v2217_v42, 0.0 }
 0x5cd   :  { %584 = vadd.xlane.f32.xlu0 %v583_v43 }
 0x5e3   :  { %589 = vrot.lane.b32.xlu0 %v2548_v10, %s2421_s3 }
 0x656   :  { %v585_v44 = vpop.xlane.xlu0 %584 }
 0x657   :  { %2218 = vrcp.f32 %v585_v44 }
 0x65a   :  { %v590_v45 = vpop.permute.xlu0 %589 }
 0x65b   :  { %v595_v46 = vsel %vm275_vm3, %v590_v45, 0 }
 0x65c   :  { %2033 = vmatpush3.bf16.msra.mxu0 %v595_v46 }
 0x65d   :  { %2044 = vmatprep.subr.bf16.mxu0 %v2410_v0 }
 0x664   :  { %v2219_v47 = vpop.eup %2218 }
 0x665   :  { %v587_v48 = vmul.f32 %v2219_v47, %v2217_v42 }
 0x667   :  { %v588_v50 = vpack.c.bf16 %v587_v48, %v587_v48 }
 0x669   :  { %2035 = vmatmul.mubr.msk.bf16.vlgmr.msra.gmra.mxu0 %vm203_vm2, %v588_v50 }
 0x66a   :  { %2045 = vmatpush3.bf16.xpose.msra.mxu0 %v693_v51  ;;  %2046 = vmatprep.mubr.msk.bf16.mxu0 %vm2411_vm0, %v2410_v0 }
 0x66b   :  { %2056 = vmatprep.subr.bf16.mxu0 %v2410_v0 }
 0x671   :  { %2047 = vmatmul.mubr.msk.bf16.vlgmr.msra.gmra.mxu0 %vm203_vm2, %v686_v52 }
 0x672   :  { %2058 = vmatprep.mubr.msk.bf16.mxu0 %vm2411_vm0, %v2410_v0  ;;  %2057 = vmatpush3.bf16.msra.mxu0 %v2699_v33 }
 0x673   :  { %2068 = vmatprep.subr.bf16.mxu0 %v2410_v0 }
 0x729   :  { %v631_v55 = vpop.f32.mrf.mxu0 }
 0x72a   :  { %v637_v56 = vpack.c.bf16 %v631_v55, %v631_v55 }
 0x72b   :  { %v2036_v57 = vpop.f32.mrf.mxu0 }
 0x72c   :  { %2041 = vmatmul.mubr.msk.bf16.vlgmr.msra.gmra.mxu1 %vm203_vm2, %v637_v56 }
 0x72d   :  { %v634_v58 = vpop.f32.mrf.mxu0  ;;  %2052 = vmatprep.mubr.msk.bf16.mxu1 %vm2411_vm0, %v2410_v0 }
 0x72f   :  { %v2037_v59 = vpop.f32.mrf.mxu0 }
 0x731   :  { %v729_v60 = vpop.f32.mrf.mxu0 }
 0x732   :  { %v735_v61 = vmul.f32 0.35355338, %v729_v60 }
 0x733   :  { %v2048_v62 = vpop.f32.mrf.mxu0 }
 0x734   :  { %v736_v1 = vadd.f32 %v735_v61, %v2574_v25 }
 0x735   :  { %v732_v5 = vpop.f32.mrf.mxu0 }
 0x736   :  { %v737_v6 = vsel %vm203_vm2, %v736_v1, -inf }
 0x737   :  { %738 = vmax.xlane.f32.xlu0 %v737_v6  ;;  %v2049_v7 = vpop.f32.mrf.mxu0 }
 0x74d   :  { %749 = vrot.lane.b32.xlu0 %v2548_v10, %s2422_s8 }
 0x751   :  { %970 = vrot.lane.b32.xlu0 %v2665_v8, %s2414_s17 }
 0x7c0   :  { %v739_v9 = vpop.xlane.xlu0 %738 }
 0x7c1   :  { %v740_v11 = vsub.f32 %v736_v1, %v739_v9 }
 0x7c3   :  { %v741_v13 = vmul.f32 1.442695, %v740_v11 }
 0x7c4   :  { %v750_v25 = vpop.permute.xlu0 %749 }
 0x7c5   :  { %2220 = vpow2.f32 %v741_v13  ;;  %v755_v14 = vsel %vm275_vm3, %v750_v25, 0 }
 0x7c6   :  { %2051 = vmatpush3.bf16.msra.mxu1 %v755_v14 }
 0x7c7   :  { %2062 = vmatprep.subr.bf16.mxu1 %v2410_v0 }
 0x7d2   :  { %v2221_v15 = vpop.eup %2220 }
 0x7d3   :  { %v743_v10 = vsel %vm203_vm2, %v2221_v15, 0.0 }
 0x7d4   :  { %744 = vadd.xlane.f32.xlu1 %v743_v10 }
 0x7e5   :  { %851 = vrot.lane.b32.xlu1 %v2665_v8, %s2413_s2 }
 0x7e9   :  { %968 = vrot.lane.b32.xlu1 %v2665_v8, %s2412_s0 }
 0x7ec   :  { %v678_v12 = vpop.f32.mrf.mxu1 }
 0x7ed   :  { %v2677_v16 = vadd.f32 %v678_v12, %v2627_v28  ;;  %v971_v28 = vpop.permute.xlu0 %970 }
 0x7ee   :  { %v2042_v17 = vpop.f32.mrf.mxu1  ;;  %v976_v30 = vsel %vm203_vm2, %v971_v28, 0 }
 0x7f0   :  { %v681_v18 = vpop.f32.mrf.mxu1 }
 0x7f2   :  { %v2043_v19 = vpop.f32.mrf.mxu1 }
 0x85d   :  { %v745_v20 = vpop.xlane.xlu1 %744 }
 0x85e   :  { %2222 = vrcp.f32 %v745_v20 }
 0x861   :  { %v852_v26 = vpop.permute.xlu1 %851 }
 0x862   :  { %v857_v29 = vsel %vm203_vm2, %v852_v26, 0 }
 0x865   :  { %v969_v31 = vpop.permute.xlu1 %968 }
 0x86b   :  { %v2223_v21 = vpop.eup %2222 }
 0x86c   :  { %v747_v23 = vmul.f32 %v2223_v21, %v2221_v15 }
 0x86e   :  { %v748_v27 = vpack.c.bf16 %v747_v23, %v747_v23 }
 0x870   :  { %2053 = vmatmul.mubr.msk.bf16.vlgmr.msra.gmra.mxu1 %vm203_vm2, %v748_v27 }
 0x871   :  { %2063 = vmatpush3.bf16.xpose.msra.mxu1 %v857_v29  ;;  %2064 = vmatprep.mubr.msk.bf16.mxu1 %vm2411_vm0, %v2410_v0 }
 0x872   :  { %2074 = vmatprep.subr.bf16.mxu1 %v2410_v0 }
 0x878   :  { %2065 = vmatmul.mubr.msk.bf16.vlgmr.msra.gmra.mxu1 %vm203_vm2, %v2665_v8 }
 0x879   :  { %2075 = vmatpush3.bf16.xpose.msra.mxu1 %v976_v30  ;;  %2076 = vmatprep.mubr.msk.bf16.mxu1 %vm2411_vm0, %v2410_v0 }
 0x87a   :  { %2086 = vmatprep.subr.bf16.mxu1 %v2410_v0 }
 0x880   :  { %2077 = vmatmul.mubr.msk.bf16.vlgmr.msra.gmra.mxu1 %vm203_vm2, %v969_v31 }
 0x881   :  { %2087 = vmatpush3.bf16.msra.mxu1 %v2612_v2  ;;  %2088 = vmatprep.mubr.msk.bf16.mxu1 %vm2411_vm0, %v2410_v0 }
 0x882   :  { %2098 = vmatprep.subr.bf16.mxu1 %v2410_v0 }
 0x930   :  { %v791_v36 = vpop.f32.mrf.mxu1 }
 0x931   :  { %v797_v2 = vpack.c.bf16 %v791_v36, %v791_v36 }
 0x932   :  { %v2054_v37 = vpop.f32.mrf.mxu1 }
 0x933   :  { %2059 = vmatmul.mubr.msk.bf16.vlgmr.msra.gmra.mxu0 %vm203_vm2, %v797_v2 }
 0x934   :  { %v794_v39 = vpop.f32.mrf.mxu1  ;;  %2070 = vmatprep.mubr.msk.bf16.mxu0 %vm2411_vm0, %v2410_v0 }
 0x936   :  { %v2055_v40 = vpop.f32.mrf.mxu1 }
 0x938   :  { %v893_v42 = vpop.f32.mrf.mxu1 }
 0x939   :  { %v899_v43 = vmul.f32 0.35355338, %v893_v42 }
 0x93a   :  { %v2066_v44 = vpop.f32.mrf.mxu1 }
 0x93b   :  { %v906_v45 = vadd.f32 %v2708_v41, %v899_v43 }
 0x93c   :  { %v896_v46 = vpop.f32.mrf.mxu1 }
 0x93d   :  { %v907_v47 = vsel %vm203_vm2, %v906_v45, -inf }
 0x93e   :  { %908 = vmax.xlane.f32.xlu0 %v907_v47  ;;  %v2067_v48 = vpop.f32.mrf.mxu1 }
 0x940   :  { %v1012_v49 = vpop.f32.mrf.mxu1 }
 0x941   :  { %v1018_v50 = vmul.f32 0.35355338, %v1012_v49 }
 0x942   :  { %v2078_v51 = vpop.f32.mrf.mxu1 }
 0x943   :  { %v1019_v52 = vadd.f32 %v1018_v50, %v2708_v41 }
 0x944   :  { %v1015_v53 = vpop.f32.mrf.mxu1 }
 0x945   :  { %v1020_v22 = vsel %vm203_vm2, %v1019_v52, -inf }
 0x946   :  { %1021 = vmax.xlane.f32.xlu1 %v1020_v22  ;;  %v2079_v24 = vpop.f32.mrf.mxu1 }
 0x957   :  { %919 = vrot.lane.b32.xlu1 %v2665_v8, %s2415_s18 }
 0x95b   :  { %1169 = vrot.lane.b32.xlu1 %v2665_v8, %s2418_s21 }
 0x95f   :  { %1167 = vrot.lane.b32.xlu1 %v2665_v8, %s2417_s20 }
 0x9c7   :  { %v909_v55 = vpop.xlane.xlu0 %908 }
 0x9c8   :  { %v910_v56 = vsub.f32 %v906_v45, %v909_v55 }
 0x9ca   :  { %v911_v57 = vmul.f32 1.442695, %v910_v56 }
 0x9cc   :  { %2224 = vpow2.f32 %v911_v57 }
 0x9cf   :  { %v1022_v58 = vpop.xlane.xlu1 %1021 }
 0x9d0   :  { %v1023_v59 = vsub.f32 %v1019_v52, %v1022_v58 }
 0x9d2   :  { %v1024_v60 = vmul.f32 1.442695, %v1023_v59 }
 0x9d3   :  { %v920_v61 = vpop.permute.xlu1 %919 }
 0x9d4   :  { %2226 = vpow2.f32 %v1024_v60  ;;  %v925_v62 = vsel %vm275_vm3, %v920_v61, 0 }
 0x9d5   :  { %2069 = vmatpush3.bf16.msra.mxu0 %v925_v62 }
 0x9d6   :  { %2080 = vmatprep.subr.bf16.mxu0 %v2410_v0 }
 0x9d7   :  { %v1170_v31 = vpop.permute.xlu1 %1169 }
 0x9d9   :  { %v2225_v1 = vpop.eup %2224 }
 0x9da   :  { %v913_v5 = vsel %vm203_vm2, %v2225_v1, 0.0 }
 0x9db   :  { %914 = vadd.xlane.f32.xlu0 %v913_v5  ;;  %v1168_v37 = vpop.permute.xlu1 %1167 }
 0x9e1   :  { %v2227_v6 = vpop.eup %2226 }
 0x9e2   :  { %v1026_v7 = vsel %vm203_vm2, %v2227_v6, 0.0 }
 0x9e3   :  { %1027 = vadd.xlane.f32.xlu0 %v1026_v7 }
 0x9f3   :  { %v838_v9 = vpop.f32.mrf.mxu0 }
 0x9f4   :  { %v2725_v11 = vadd.f32 %v838_v9, %v2677_v16 }
 0x9f5   :  { %v2060_v13 = vpop.f32.mrf.mxu0 }
 0x9f7   :  { %v841_v25 = vpop.f32.mrf.mxu0 }
 0x9f9   :  { %v2061_v14 = vpop.f32.mrf.mxu0  ;;  %1032 = vrot.lane.b32.xlu0 %v2665_v8, %s2416_s19 }
 0xa64   :  { %v915_v15 = vpop.xlane.xlu0 %914 }
 0xa65   :  { %2228 = vrcp.f32 %v915_v15  ;;  %v1894_v15 = vld [vmem:[#allocation7] ss:$0 sm:$0xff] }
 0xa6c   :  { %v1028_v10 = vpop.xlane.xlu0 %1027 }
 0xa6d   :  { %2230 = vrcp.f32 %v1028_v10 }
 0xa70   :  { %v1033_v18 = vpop.permute.xlu0 %1032 }
 0xa71   :  { %v1038_v20 = vsel %vm275_vm3, %v1033_v18, 0 }
 0xa72   :  { %v2229_v12 = vpop.eup %2228 }
 0xa73   :  { %v917_v17 = vmul.f32 %v2229_v12, %v2225_v1 }
 0xa75   :  { %v918_v19 = vpack.c.bf16 %v917_v17, %v917_v17  ;;  %v1488_v17 = vadd.f32 %v1894_v15, %v2725_v11 }
 0xa77   :  { %2071 = vmatmul.mubr.msk.bf16.vlgmr.msra.gmra.mxu0 %vm203_vm2, %v918_v19 }
 0xa78   :  { %2081 = vmatpush3.bf16.msra.mxu0 %v1038_v20  ;;  %2082 = vmatprep.mubr.msk.bf16.mxu0 %vm2411_vm0, %v2410_v0 }
 0xa79   :  { %2092 = vmatprep.subr.bf16.mxu0 %v2410_v0 }
 0xa7a   :  { %v2231_v16 = vpop.eup %2230 }
 0xa7b   :  { %v1030_v21 = vmul.f32 %v2231_v16, %v2227_v6 }
 0xa7d   :  { %v1031_v23 = vpack.c.bf16 %v1030_v21, %v1030_v21  ;;  %v1490_v21 = vadd.f32 %v1488_v17, %v2534_v3 }
 0xa7f   :  { %2083 = vmatmul.mubr.msk.bf16.vlgmr.msra.gmra.mxu0 %vm203_vm2, %v1031_v23 }
 0xa80   :  { %2093 = vmatpush3.bf16.msra.mxu0 %v2604_v63  ;;  %2094 = vmatprep.mubr.msk.bf16.mxu0 %vm2411_vm0, %v2410_v0  ;;  %v1175_v63 = vsel %vm203_vm2, %v1170_v31, 0 }
 0xa81   :  { %2104 = vmatprep.subr.bf16.mxu0 %v2410_v0 }
 0xb37   :  { %v961_v26 = vpop.f32.mrf.mxu0 }
 0xb38   :  { %v967_v27 = vpack.c.bf16 %v961_v26, %v961_v26  ;;  %v1494_v26 = vsel %vm147_vm1, %v1490_v21, 0.0 }
 0xb39   :  { %v2072_v29 = vpop.f32.mrf.mxu0 }
 0xb3a   :  { %2095 = vmatmul.mubr.msk.bf16.vlgmr.msra.gmra.mxu0 %vm203_vm2, %v967_v27 }
 0xb3b   :  { %v964_v28 = vpop.f32.mrf.mxu0  ;;  %2106 = vmatprep.mubr.msk.bf16.mxu0 %vm2411_vm0, %v2410_v0 }
 0xb3d   :  { %v2073_v30 = vpop.f32.mrf.mxu0 }
 0xb3f   :  { %v1074_v32 = vpop.f32.mrf.mxu0 }
 0xb40   :  { %v1080_v34 = vpack.c.bf16 %v1074_v32, %v1074_v32 }
 0xb41   :  { %v2084_v35 = vpop.f32.mrf.mxu0 }
 0xb42   :  { %2089 = vmatmul.mubr.msk.bf16.vlgmr.msra.gmra.mxu1 %vm203_vm2, %v1080_v34 }
 0xb43   :  { %2099 = vmatpush3.bf16.xpose.msra.mxu1 %v1175_v63  ;;  %v1077_v36 = vpop.f32.mrf.mxu0  ;;  %2100 = vmatprep.mubr.msk.bf16.mxu1 %vm2411_vm0, %v2410_v0 }
 0xb44   :  { %2110 = vmatprep.subr.bf16.mxu1 %v2410_v0 }
 0xb45   :  { %v2085_v2 = vpop.f32.mrf.mxu0 }
 0xb4a   :  { %2101 = vmatmul.mubr.msk.bf16.vlgmr.msra.gmra.mxu1 %vm203_vm2, %v1168_v37 }
 0xb4b   :  { %2111 = vmatpush3.bf16.msra.mxu1 %v2652_v54  ;;  %2112 = vmatprep.mubr.msk.bf16.mxu1 %vm2411_vm0, %v2410_v0 }
 0xb4c   :  { %2122 = vmatprep.subr.bf16.mxu1 %v2410_v0 }
 0xbfa   :  { %v1161_v38 = vpop.f32.mrf.mxu0 }
 0xbfc   :  { %v2096_v39 = vpop.f32.mrf.mxu0 }
 0xbfe   :  { %v1164_v40 = vpop.f32.mrf.mxu0 }
 0xc00   :  { %v2097_v42 = vpop.f32.mrf.mxu0 }
 0xc02   :  { %v1118_v43 = vpop.f32.mrf.mxu1 }
 0xc03   :  { %v2752_v44 = vadd.f32 %v1161_v38, %v1118_v43 }
 0xc04   :  { %v2090_v45 = vpop.f32.mrf.mxu1 }
 0xc06   :  { %v1121_v46 = vpop.f32.mrf.mxu1 }
 0xc08   :  { %v2091_v47 = vpop.f32.mrf.mxu1 }
 0xc0a   :  { %v1211_v48 = vpop.f32.mrf.mxu1 }
 0xc0b   :  { %v1217_v49 = vmul.f32 0.35355338, %v1211_v48 }
 0xc0c   :  { %v2102_v50 = vpop.f32.mrf.mxu1 }
 0xc0d   :  { %v1218_v54 = vadd.f32 %v1217_v49, %v2708_v41 }
 0xc0e   :  { %v1214_v51 = vpop.f32.mrf.mxu1 }
 0xc0f   :  { %v1219_v52 = vsel %vm203_vm2, %v1218_v54, -inf }
 0xc10   :  { %1220 = vmax.xlane.f32.xlu0 %v1219_v52  ;;  %v2103_v53 = vpop.f32.mrf.mxu1 }
 0xc26   :  { %1231 = vrot.lane.b32.xlu0 %v2665_v8, %s2421_s3 }
 0xc2a   :  { %1324 = vrot.lane.b32.xlu0 %v2665_v8, %s2420_s26 }
 0xc99   :  { %v1221_v22 = vpop.xlane.xlu0 %1220 }
 0xc9a   :  { %v1222_v24 = vsub.f32 %v1218_v54, %v1221_v22 }
 0xc9c   :  { %v1223_v55 = vmul.f32 1.442695, %v1222_v24 }
 0xc9d   :  { %v1232_v56 = vpop.permute.xlu0 %1231 }
 0xc9e   :  { %2232 = vpow2.f32 %v1223_v55  ;;  %v1237_v57 = vsel %vm275_vm3, %v1232_v56, 0 }
 0xc9f   :  { %2105 = vmatpush3.bf16.msra.mxu0 %v1237_v57 }
 0xca0   :  { %2116 = vmatprep.subr.bf16.mxu0 %v2410_v0 }
 0xca1   :  { %v1325_v7 = vpop.permute.xlu0 %1324 }
 0xcab   :  { %v2233_v58 = vpop.eup %2232 }
 0xcac   :  { %v1225_v59 = vsel %vm203_vm2, %v2233_v58, 0.0 }
 0xcad   :  { %1226 = vadd.xlane.f32.xlu1 %v1225_v59 }
 0xcbe   :  { %1326 = vrot.lane.b32.xlu1 %v2665_v8, %s2419_s25 }
 0xd36   :  { %v1227_v60 = vpop.xlane.xlu1 %1226 }
 0xd37   :  { %2234 = vrcp.f32 %v1227_v60  ;;  %v2196_v60 = vld [vmem:[%s2876_s7 + $0x8] sm:$0xff]  }
 0xd3a   :  { %v1327_v1 = vpop.permute.xlu1 %1326 }
 0xd3b   :  { %v1332_v6 = vsel %vm203_vm2, %v1327_v1, 0 }
 0xd44   :  { %v2235_v61 = vpop.eup %2234 }
 0xd45   :  { %v1229_v62 = vmul.f32 %v2235_v61, %v2233_v58 }
 0xd47   :  { %v1230_v5 = vpack.c.bf16 %v1229_v62, %v1229_v62 }
 0xd49   :  { %2107 = vmatmul.mubr.msk.bf16.vlgmr.msra.gmra.mxu0 %vm203_vm2, %v1230_v5 }
 0xd4a   :  { %2117 = vmatpush3.bf16.xpose.msra.mxu0 %v1332_v6  ;;  %2118 = vmatprep.mubr.msk.bf16.mxu0 %vm2411_vm0, %v2410_v0 }
 0xd4b   :  { %2128 = vmatprep.subr.bf16.mxu0 %v2410_v0 }
 0xd51   :  { %2119 = vmatmul.mubr.msk.bf16.vlgmr.msra.gmra.mxu0 %vm203_vm2, %v1325_v7 }
 0xd52   :  { %2129 = vmatpush3.bf16.msra.mxu0 %v2699_v33  ;;  %2130 = vmatprep.mubr.msk.bf16.mxu0 %vm2411_vm0, %v2410_v0 }
 0xd53   :  { %2142 = vmatprep.subr.bf16.mxu0 %v2410_v0 }
 0xe09   :  { %v1273_v9 = vpop.f32.mrf.mxu0 }
 0xe0a   :  { %v1279_v13 = vpack.c.bf16 %v1273_v9, %v1273_v9 }
 0xe0b   :  { %v2108_v25 = vpop.f32.mrf.mxu0 }
 0xe0c   :  { %2113 = vmatmul.mubr.msk.bf16.vlgmr.msra.gmra.mxu1 %vm203_vm2, %v1279_v13  ;;  %v1895_v25 = vld [vmem:[#allocation8] ss:$0 sm:$0xff] }
 0xe0d   :  { %v1276_v14 = vpop.f32.mrf.mxu0  ;;  %2124 = vmatprep.mubr.msk.bf16.mxu1 %vm2411_vm0, %v2410_v0 }
 0xe0f   :  { %v2109_v10 = vpop.f32.mrf.mxu0 }
 0xe11   :  { %v1368_v12 = vpop.f32.mrf.mxu0 }
 0xe12   :  { %v1374_v33 = vmul.f32 0.35355338, %v1368_v12  ;;  %v1896_v12 = vld [vmem:[#allocation8 + $0x1] ss:$0 sm:$0xff] }
 0xe13   :  { %v2120_v18 = vpop.f32.mrf.mxu0 }
 0xe14   :  { %v1375_v19 = vadd.f32 %v1374_v33, %v2708_v41 }
 0xe15   :  { %v1371_v20 = vpop.f32.mrf.mxu0 }
 0xe16   :  { %v1376_v16 = vsel %vm203_vm2, %v1375_v19, -inf  ;;  %v2198_v20 = vld [vmem:[%s2878_s9 + $0x38] sm:$0xff]  }
 0xe17   :  { %1377 = vmax.xlane.f32.xlu1 %v1376_v16  ;;  %v2121_v23 = vpop.f32.mrf.mxu0  ;;  %v2199_v16 = vld [vmem:[%s2878_s9 + $0x30] sm:$0xff]  }
 0xe18   :  { %v2201_v23 = vld [vmem:[%s2878_s9 + $0x20] sm:$0xff]  }
 0xe1b   :  { %1495 = vadd.xlane.f32.xlu1 %v1494_v26  ;;  %v2202_v26 = vld [vmem:[%s2878_s9 + $0x18] sm:$0xff]  }
 0xea0   :  { %v1378_v27 = vpop.xlane.xlu1 %1377 }
 0xea1   :  { %v1379_v29 = vsub.f32 %v1375_v19, %v1378_v27  ;;  %v2203_v27 = vld [vmem:[%s2878_s9 + $0x10] sm:$0xff]  }
 0xea3   :  { %v1380_v28 = vmul.f32 1.442695, %v1379_v29  ;;  %v2204_v29 = vld [vmem:[%s2878_s9 + $0x8] sm:$0xff]  }
 0xea5   :  { %2236 = vpow2.f32 %v1380_v28  ;;  %v2205_v28 = vld [vmem:[%s2878_s9] sm:$0xff]  }
 0xeb2   :  { %v2237_v30 = vpop.eup %2236 }
 0xeb3   :  { %v1382_v11 = vsel %vm203_vm2, %v2237_v30, 0.0 }
 0xeb4   :  { %1383 = vadd.xlane.f32.xlu0 %v1382_v11 }
 0xeca   :  { %1388 = vrot.lane.b32.xlu0 %v2665_v8, %s2422_s8 }
 0xecc   :  { %v1317_v41 = vpop.f32.mrf.mxu1 }
 0xecd   :  { %v1323_v31 = vadd.f32 %v1317_v41, %v2752_v44  ;;  %v1496_v44 = vpop.xlane.xlu1 %1495 }
 0xece   :  { %v2114_v3 = vpop.f32.mrf.mxu1  ;;  %v1501_v45 = vmul.f32 0.03125, %v1496_v44 }
 0xed0   :  { %v1320_v32 = vpop.f32.mrf.mxu1  ;;  %v1503_v49 = vsub.f32 %v1490_v21, %v1501_v45  ;;  %v2200_v21 = vld [vmem:[%s2878_s9 + $0x28] sm:$0xff]  }
 0xed2   :  { %v2115_v34 = vpop.f32.mrf.mxu1  ;;  %v1505_v22 = vmul.f32 %v1503_v49, %v1503_v49 }
 0xed4   :  { %v1507_v24 = vsel %vm147_vm1, %v1505_v22, 0.0 }
 0xf3d   :  { %v1384_v35 = vpop.xlane.xlu0 %1383 }
 0xf3e   :  { %2238 = vrcp.f32 %v1384_v35 }
 0xf41   :  { %v1389_v63 = vpop.permute.xlu0 %1388 }
 0xf42   :  { %v1394_v36 = vsel %vm275_vm3, %v1389_v63, 0 }
 0xf43   :  { %2123 = vmatpush3.bf16.msra.mxu1 %v1394_v36 }
 0xf44   :  { %2134 = vmatprep.subr.bf16.mxu1 %v2410_v0 }
 0xf4b   :  { %v2239_v2 = vpop.eup %2238 }
 0xf4c   :  { %v1386_v37 = vmul.f32 %v2239_v2, %v2237_v30  ;;  %v1897_v30 = vld [vmem:[#allocation10] ss:$0 sm:$0xff] }
 0xf4e   :  { %v1387_v38 = vpack.c.bf16 %v1386_v37, %v1386_v37 }
 0xf50   :  { %2125 = vmatmul.mubr.msk.bf16.vlgmr.msra.gmra.mxu1 %vm203_vm2, %v1387_v38 }
 0xf51   :  { %2138 = vmatprep.mubr.msk.bf16.mxu1 %vm2411_vm0, %v2410_v0  ;;  %2135 = vmatpush3.bf16.msra.mxu1 %v2196_v60 }
 0xf52   :  { %2136 = vmatprep.subr.bf16.mxu1 %v2410_v0 }
0x1010   :  { %v1430_v8 = vpop.f32.mrf.mxu1 }
0x1011   :  { %v1436_v39 = vpack.c.bf16 %v1430_v8, %v1430_v8 }
0x1012   :  { %v2126_v40 = vpop.f32.mrf.mxu1 }
0x1013   :  { %2131 = vmatmul.mubr.msk.bf16.vlgmr.msra.gmra.mxu0 %vm203_vm2, %v1436_v39 }
0x1014   :  { %v1433_v42 = vpop.f32.mrf.mxu1  ;;  %2158 = vmatprep.mubr.msk.bf16.mxu0 %vm2411_vm0, %v2410_v0  ;;  %2143 = vmatpush3.bf16.msra.mxu0 %v2198_v20 }
0x1015   :  { %2144 = vmatprep.subr.bf16.mxu0 %v2410_v0 }
0x1016   :  { %v2127_v43 = vpop.f32.mrf.mxu1 }
0x1018   :  { %2145 = vmatpush3.bf16.msra.mxu0 %v2199_v16 }
0x1019   :  { %2146 = vmatprep.subr.bf16.mxu0 %v2410_v0 }
0x101c   :  { %2147 = vmatpush3.bf16.msra.mxu0 %v2200_v21  ;;  %v1910_v21 = vld [vmem:[%s2880_s11] ss:$0 sm:$0xff] }
0x101d   :  { %2148 = vmatprep.subr.bf16.mxu0 %v2410_v0 }
0x1020   :  { %2149 = vmatpush3.bf16.msra.mxu0 %v2201_v23 }
0x1021   :  { %2150 = vmatprep.subr.bf16.mxu0 %v2410_v0 }
0x1024   :  { %2151 = vmatpush3.bf16.msra.mxu0 %v2202_v26 }
0x1025   :  { %2152 = vmatprep.subr.bf16.mxu0 %v2410_v0 }
0x1028   :  { %2153 = vmatpush3.bf16.msra.mxu0 %v2203_v27 }
0x1029   :  { %2154 = vmatprep.subr.bf16.mxu0 %v2410_v0 }
0x102c   :  { %2155 = vmatpush3.bf16.msra.mxu0 %v2204_v29 }
0x102d   :  { %2156 = vmatprep.subr.bf16.mxu0 %v2410_v0 }
0x1030   :  { %2157 = vmatpush3.bf16.msra.mxu0 %v2205_v28 }
0x10d3   :  { %v1474_v46 = vpop.f32.mrf.mxu0 }
0x10d4   :  { %v1480_v47 = vadd.f32 %v1474_v46, %v1323_v31 }
0x10d5   :  { %v2132_v48 = vpop.f32.mrf.mxu0 }
0x10d6   :  { %v1489_v50 = vadd.f32 %v1894_v15, %v1480_v47 }
0x10d7   :  { %v1477_v54 = vpop.f32.mrf.mxu0 }
0x10d8   :  { %v1491_v51 = vadd.f32 %v1489_v50, %v2539_v4  ;;  %v2197_v4 = vld [vmem:[%s2876_s7] sm:$0xff]  }
0x10d9   :  { %v2133_v52 = vpop.f32.mrf.mxu0  ;;  %2137 = vmatpush3.bf16.msra.mxu1 %v2197_v4 }
0x10da   :  { %v1497_v53 = vsel %vm147_vm1, %v1491_v51, 0.0  ;;  %2162 = vmatprep.subr.bf16.mxu1 %v2410_v0 }
0x10db   :  { %1498 = vadd.xlane.f32.xlu1 %v1497_v53 }
0x10df   :  { %1508 = vadd.xlane.f32.xlu1 %v1507_v24 }
0x1164   :  { %v1499_v55 = vpop.xlane.xlu1 %1498 }
0x1165   :  { %v1502_v56 = vmul.f32 0.03125, %v1499_v55 }
0x1167   :  { %v1504_v57 = vsub.f32 %v1491_v51, %v1502_v56  ;;  %v1901_v51 = vld [vmem:[#allocation11] ss:$0 sm:$0xff] }
0x1168   :  { %v1509_v61 = vpop.xlane.xlu1 %1508 }
0x1169   :  { %v1506_v58 = vmul.f32 %v1504_v57, %v1504_v57  ;;  %v1513_v62 = vmul.f32 0.03125, %v1509_v61 }
0x116b   :  { %v1510_v59 = vsel %vm147_vm1, %v1506_v58, 0.0  ;;  %v1515_v1 = vadd.f32 1e-05, %v1513_v62 }
0x116c   :  { %1511 = vadd.xlane.f32.xlu1 %v1510_v59 }
0x116d   :  { %2240 = vrsqrt.f32 %v1515_v1 }
0x117a   :  { %v2241_v9 = vpop.eup %2240 }
0x117b   :  { %v1519_v13 = vmul.f32 %v2241_v9, %v1503_v49 }
0x117d   :  { %v1525_v10 = vmul.f32 %v1895_v25, %v1519_v13 }
0x117f   :  { %v1531_v33 = vadd.f32 %v1896_v12, %v1525_v10 }
0x11f5   :  { %v1512_v5 = vpop.xlane.xlu1 %1511 }
0x11f6   :  { %v1514_v6 = vmul.f32 0.03125, %v1512_v5 }
0x11f8   :  { %v1516_v7 = vadd.f32 1e-05, %v1514_v6 }
0x11fa   :  { %2242 = vrsqrt.f32 %v1516_v7 }
0x1207   :  { %v2243_v14 = vpop.eup %2242 }
0x1208   :  { %v1520_v15 = vmul.f32 %v2243_v14, %v1504_v57  ;;  %v2206_v14 = vld [vmem:[%s2881_s12 + $0x8] sm:$0xff]  }
0x120a   :  { %v1526_v17 = vmul.f32 %v1895_v25, %v1520_v15  ;;  %v2207_v15 = vld [vmem:[%s2881_s12] sm:$0xff]  }
0x120c   :  { %v2807_v18 = vadd.f32 %v1896_v12, %v1526_v17 }
0x120e   :  { %v1533_v19 = vpack.c.bf16 %v2807_v18, %v1531_v33 }
0x1210   :  { %2139 = vmatmul.mubr.msk.bf16.vlgmr.msra.gmra.mxu1 %vm147_vm1, %v1533_v19 }
0x1211   :  { %2166 = vmatprep.mubr.msk.bf16.mxu1 %vm2411_vm0, %v2410_v0  ;;  %2163 = vmatpush3.bf16.msra.mxu1 %v2206_v14 }
0x1212   :  { %2164 = vmatprep.subr.bf16.mxu1 %v2410_v0  ;;  %v1911_v0 = vld [vmem:[%s2880_s11 + $0x1] ss:$0 sm:$0xff]  ;;  %s2372_s11 = scalar_lea.vmem %s1850_s15, 256 }
0x1213   :  { %p2373_p2 = scmp.ne.s32.totalorder %s1850_s15, %s2372_s11  ;;  %p2378_p4 = scmp.lt.s32.totalorder %s2372_s11, %s2372_s11 }
0x1215   :  { %2165 = vmatpush3.bf16.msra.mxu1 %v2207_v15  ;;  %p2379_p5 = por %p2378_p4, %p2377_p3 }
0x1217   :  { %p2380_p6 = pnand %p2379_p5, %p2373_p2 }
0x12d0   :  { %v1594_v11 = vpop.f32.mrf.mxu1 }
0x12d1   :  { %v1595_v41 = vadd.f32 %v1897_v30, %v1594_v11 }
0x12d2   :  { %v2140_v31 = vpop.f32.mrf.mxu1 }
0x12d3   :  { %v1601_v3 = vmul.f32 %v1595_v41, %v1595_v41 }
0x12d4   :  { %v1597_v32 = vpop.f32.mrf.mxu1 }
0x12d5   :  { %v1603_v34 = vmul.f32 %v1601_v3, %v1595_v41  ;;  %v1598_v35 = vadd.f32 %v1897_v30, %v1597_v32 }
0x12d6   :  { %v2141_v63 = vpop.f32.mrf.mxu1 }
0x12d7   :  { %v1605_v36 = vmul.f32 0.044715, %v1603_v34  ;;  %v1602_v2 = vmul.f32 %v1598_v35, %v1598_v35 }
0x12d9   :  { %v1607_v37 = vadd.f32 %v1605_v36, %v1595_v41  ;;  %v1604_v38 = vmul.f32 %v1602_v2, %v1598_v35 }
0x12db   :  { %v1609_v8 = vmul.f32 0.7978846, %v1607_v37  ;;  %v1606_v39 = vmul.f32 0.044715, %v1604_v38 }
0x12dd   :  { %2244 = vtanh.f32 %v1609_v8  ;;  %v1608_v40 = vadd.f32 %v1606_v39, %v1598_v35 }
0x12df   :  { %v1610_v42 = vmul.f32 0.7978846, %v1608_v40 }
0x12e1   :  { %2246 = vtanh.f32 %v1610_v42 }
0x12ea   :  { %v2245_v43 = vpop.eup %2244 }
0x12eb   :  { %v1613_v44 = vadd.f32 1.0, %v2245_v43 }
0x12ed   :  { %v1615_v46 = vmul.f32 0.5, %v1613_v44 }
0x12ee   :  { %v2247_v45 = vpop.eup %2246 }
0x12ef   :  { %v1614_v47 = vadd.f32 1.0, %v2247_v45  ;;  %v1617_v49 = vmul.f32 %v1615_v46, %v1595_v41  ;;  %v1912_v41 = vld [vmem:[%s2882_s13] ss:$0 sm:$0xff] }
0x12f1   :  { %v1616_v48 = vmul.f32 0.5, %v1614_v47 }
0x12f3   :  { %v1618_v50 = vmul.f32 %v1616_v48, %v1598_v35 }
0x12f5   :  { %v1619_v54 = vpack.c.bf16 %v1618_v50, %v1617_v49 }
0x12f7   :  { %2159 = vmatmul.mubr.bf16.vlgmr.msra.gmra.mxu0 %v1619_v54 }
0x13b7   :  { %v1725_v52 = vpop.f32.mrf.mxu0 }
0x13b8   :  { %v1726_v53 = vadd.f32 %v1901_v51, %v1725_v52 }
0x13b9   :  { %v2160_v22 = vpop.f32.mrf.mxu0 }
0x13ba   :  { %v1732_v24 = vadd.f32 %v1726_v53, %v1531_v33 }
0x13bb   :  { %v1728_v55 = vpop.f32.mrf.mxu0 }
0x13bc   :  { %v1729_v56 = vadd.f32 %v1901_v51, %v1728_v55  ;;  %v1736_v57 = vsel %vm147_vm1, %v1732_v24, 0.0 }
0x13bd   :  { %1737 = vadd.xlane.f32.xlu1 %v1736_v57  ;;  %v2161_v58 = vpop.f32.mrf.mxu0 }
0x13be   :  { %v1733_v59 = vadd.f32 %v1729_v56, %v2807_v18 }
0x13c0   :  { %v1739_v60 = vsel %vm147_vm1, %v1733_v59, 0.0 }
0x13c1   :  { %1740 = vadd.xlane.f32.xlu1 %v1739_v60 }
0x1446   :  { %v1738_v4 = vpop.xlane.xlu1 %1737 }
0x1447   :  { %v1742_v61 = vmul.f32 0.03125, %v1738_v4 }
0x1449   :  { %v1744_v62 = vsub.f32 %v1732_v24, %v1742_v61 }
0x144a   :  { %v1741_v1 = vpop.xlane.xlu1 %1740 }
0x144b   :  { %v1743_v5 = vmul.f32 0.03125, %v1741_v1  ;;  %v1746_v6 = vmul.f32 %v1744_v62, %v1744_v62 }
0x144d   :  { %v1745_v7 = vsub.f32 %v1733_v59, %v1743_v5  ;;  %v1748_v9 = vsel %vm147_vm1, %v1746_v6, 0.0 }
0x144e   :  { %1749 = vadd.xlane.f32.xlu0 %v1748_v9 }
0x144f   :  { %v1747_v13 = vmul.f32 %v1745_v7, %v1745_v7 }
0x1451   :  { %v1751_v25 = vsel %vm147_vm1, %v1747_v13, 0.0 }
0x1452   :  { %1752 = vadd.xlane.f32.xlu1 %v1751_v25 }
0x14d7   :  { %v1750_v10 = vpop.xlane.xlu0 %1749 }
0x14d8   :  { %v1754_v12 = vmul.f32 0.03125, %v1750_v10 }
0x14da   :  { %v1756_v17 = vadd.f32 1e-05, %v1754_v12 }
0x14db   :  { %v1753_v33 = vpop.xlane.xlu1 %1752 }
0x14dc   :  { %2248 = vrsqrt.f32 %v1756_v17  ;;  %v1755_v18 = vmul.f32 0.03125, %v1753_v33 }
0x14de   :  { %v1757_v19 = vadd.f32 1e-05, %v1755_v18 }
0x14e0   :  { %2250 = vrsqrt.f32 %v1757_v19 }
0x14e9   :  { %v2249_v20 = vpop.eup %2248 }
0x14ea   :  { %v1760_v16 = vmul.f32 %v2249_v20, %v1744_v62 }
0x14ec   :  { %v1766_v27 = vmul.f32 %v1910_v21, %v1760_v16 }
0x14ed   :  { %v2251_v23 = vpop.eup %2250 }
0x14ee   :  { %v1761_v26 = vmul.f32 %v2251_v23, %v1745_v7  ;;  %v1772_v28 = vadd.f32 %v1911_v0, %v1766_v27 }
0x14f0   :  { %v1767_v29 = vmul.f32 %v1910_v21, %v1761_v26 }
0x14f2   :  { %v1773_v30 = vadd.f32 %v1911_v0, %v1767_v29 }
0x14f4   :  { %v1774_v11 = vpack.c.bf16 %v1773_v30, %v1772_v28 }
0x14f6   :  { %2167 = vmatmul.mubr.msk.bf16.vlgmr.msra.gmra.mxu1 %vm147_vm1, %v1774_v11 }
0x15b6   :  { %v1835_v31 = vpop.f32.mrf.mxu1 }
0x15b7   :  { %v1836_v3 = vadd.f32 %v1912_v41, %v1835_v31 }
0x15b8   :  { %v2168_v32 = vpop.f32.mrf.mxu1 }
0x15b9   :  { %1842 = vst [vmem:[#allocation13] sm:$0xff] %v1836_v3 }
0x15ba   :  { %v1838_v34 = vpop.f32.mrf.mxu1 }
0x15bb   :  { %v1839_v35 = vadd.f32 %v1912_v41, %v1838_v34 }
0x15bc   :  { %v2169_v63 = vpop.f32.mrf.mxu1 }
0x15bd   :  { %1843 = vst [vmem:[#allocation13 + $0x8] sm:$0xff] %v1839_v35 }
0x15be   :  { %2383 = shalt.err (!%p2380_p6)
}
0x15bf   :  { %s2424_s7 = smov 128   ;;  %s2425_s13 = smov 8  }
0x15c0   :  { %1855 = dma.vmem_to_hbm [thread:$0]  %s1850_s15, 256, %s2883_s14, [#allocation4], %s2424_s7, %s2424_s7, %s2425_s13  }
0x15c1   :  { %2400 = dma.done.wait [#allocation4], 256  }
0x15c2   :  { %2401 = vsyncadd [#allocation4], 4294967040 }
0x15c3   :  { %1859 = vsyncpa [#allocation3], 1 }
0x15c4   :  { %1860 = vsyncpa [#allocation6], 1 }
0x15c5   :  { %1861 = vsyncpa [#allocation9], 1 }
0x15c6   :  { %1862 = vsyncpa [#allocation12], 1 }
0x15c7   :  { %1863 = vsyncpa [#allocation4], 1 }

</bundles_post_ra>
